<compile_context>
chip_gen: v7x
topology: tpu7x:2x2x1
jax: 0.10.0
libtpu: 0.0.40
codegen_flags: <defaults>
</compile_context>

<pallas_src>
import math
from functools import partial

import jax
import jax.numpy as jnp
from jax import lax
from jax.experimental import pallas as pl
from jax.experimental.pallas import tpu as pltpu

_EPS = 1e-5


def _fused_transformer_kernel(
    x_ref,                       # [Bt, Lp, E]     input activations (io dtype)
    g1_ref, b1_ref,              # [1, 1, E]       ln_1 gamma / beta (f32)
    wqkv_ref, bqkv_ref,          # [1, E, 3E] md / [1, 1, 3E] f32 (Q pre-scaled)
    wo_ref, bo_ref,              # [1, E, E] md  / [1, 1, E] f32
    g2_ref, b2_ref,              # [1, 1, E]       ln_2 gamma / beta (f32)
    wfc_ref, bfc_ref,            # [1, E, 4E] md / [1, 1, 4E] f32
    wproj_ref, bproj_ref,        # [1, 4E, E] md / [1, 1, E] f32
    o_ref,                       # [Bt, Lp, E]     output (f32)
    acc_ref,                     # scratch [Bt*Lp, E] f32 (activation carry)
    *, n_head, l_valid):
    layer = pl.program_id(1)
    Bt, Lp, E = x_ref.shape
    H = n_head
    dh = E // H
    T = Bt * Lp
    md = wqkv_ref.dtype          # matmul operand dtype (bf16 or f32)

    # Load the activation into the VMEM carry at the first layer (whole block).
    @pl.when(layer == 0)
    def _():
        acc_ref[...] = x_ref[...].astype(jnp.float32).reshape(T, E)

    x = acc_ref[...]                                   # [T, E] f32

    # ---- LayerNorm 1 (f32) ----
    mu = jnp.mean(x, axis=-1, keepdims=True)
    xc = x - mu
    var = jnp.mean(xc * xc, axis=-1, keepdims=True)
    xn = xc * lax.rsqrt(var + _EPS) * g1_ref[0] + b1_ref[0]

    # ---- QKV projection (weights pre-transposed, 1/sqrt(dh) folded into Q) ----
    qkv = jnp.dot(xn.astype(md), wqkv_ref[0],
                  preferred_element_type=jnp.float32) + bqkv_ref[0]     # [T, 3E]

    def heads(z):                                      # [T, E] md -> [Bt*H, Lp, dh]
        z = z.reshape(Bt, Lp, H, dh)
        z = jnp.swapaxes(z, 1, 2)                      # [Bt, H, Lp, dh]
        return z.reshape(Bt * H, Lp, dh)

    qh = heads(qkv[:, :E].astype(md))
    kh = heads(qkv[:, E:2 * E].astype(md))
    vh = heads(qkv[:, 2 * E:].astype(md))

    # ---- Multi-head self-attention, batched over Bt*H ----
    s = jnp.einsum('bqd,bkd->bqk', qh, kh,
                   preferred_element_type=jnp.float32)                  # [Bt*H, Lp, Lp]
    if l_valid < Lp:                                   # mask padded key columns
        col = lax.broadcasted_iota(jnp.int32, (1, 1, Lp), 2)
        s = jnp.where(col < l_valid, s, -1e30)
    m = jnp.max(s, axis=-1, keepdims=True)
    # exp in matmul dtype (bf16 EUP on v6e/v7x; lowered via f32 on v5e).
    p = jnp.exp((s - m).astype(md))                                     # [Bt*H, Lp, Lp]
    denom = jnp.sum(p.astype(jnp.float32), axis=-1, keepdims=True)      # f32
    o = jnp.einsum('bqk,bkd->bqd', p, vh,
                   preferred_element_type=jnp.float32)                  # [Bt*H, Lp, dh]
    o = (o * pl.reciprocal(denom, approx=True)).astype(md)

    # merge heads and apply out_proj as ONE [T,E] x [E,E] matmul.
    o2 = jnp.swapaxes(o.reshape(Bt, H, Lp, dh), 1, 2).reshape(T, E)
    attn_out = jnp.dot(o2, wo_ref[0],
                       preferred_element_type=jnp.float32) + bo_ref[0]  # [T, E]

    x = x + attn_out                                   # residual 1 (drop_path1 = Identity)

    # ---- LayerNorm 2 (f32) ----
    mu2 = jnp.mean(x, axis=-1, keepdims=True)
    xc2 = x - mu2
    var2 = jnp.mean(xc2 * xc2, axis=-1, keepdims=True)
    xn2 = xc2 * lax.rsqrt(var2 + _EPS) * g2_ref[0] + b2_ref[0]

    # ---- MLP: c_fc -> QuickGELU (f32) -> c_proj  (dropout = Identity) ----
    h1 = jnp.dot(xn2.astype(md), wfc_ref[0],
                 preferred_element_type=jnp.float32) + bfc_ref[0]       # [T, 4E]
    h1 = h1 * jax.nn.sigmoid(1.702 * h1)
    h2 = jnp.dot(h1.astype(md), wproj_ref[0],
                 preferred_element_type=jnp.float32) + bproj_ref[0]     # [T, E]

    x_new = x + h2                                     # residual 2 (drop_path2 = Identity)
    acc_ref[...] = x_new

    @pl.when(layer == pl.num_programs(1) - 1)
    def _():
        o_ref[...] = x_new.reshape(Bt, Lp, E).astype(o_ref.dtype)


# ------------------------- host-side parameter packing ------------------------
def pack_params(params, n_head, matmul_dtype=jnp.bfloat16):
    """Pre-transpose / pre-scale / stack per-layer torch-layout params."""
    cols = [[] for _ in range(12)]
    for p in params:
        g1, b1, wqkv, bqkv, wo, bo, g2, b2, wfc, bfc, wp, bp = p
        E = g1.shape[-1]
        dh = E // n_head
        scale = 1.0 / math.sqrt(dh)
        wqkv_t = wqkv.T                                   # [E, 3E]
        # fold 1/sqrt(dh) into Q rows/bias (applied in f32, before any bf16 cast)
        wqkv_t = wqkv_t.at[:, :E].multiply(scale)
        bqkv_s = bqkv.at[:E].multiply(scale)
        for c, v in zip(cols, (g1, b1, wqkv_t, bqkv_s, wo.T, bo,
                               g2, b2, wfc.T, bfc, wp.T, bp)):
            c.append(v)

    def stk_w(lst):                                       # matrices -> matmul dtype
        return jnp.stack(lst).astype(matmul_dtype)

    def stk_v(lst):                                       # vectors -> [layers, 1, X] f32
        return jnp.stack(lst)[:, None, :].astype(jnp.float32)

    (g1, b1, wqkv, bqkv, wo, bo, g2, b2, wfc, bfc, wp, bp) = cols
    return (stk_v(g1), stk_v(b1),
            stk_w(wqkv), stk_v(bqkv),
            stk_w(wo), stk_v(bo),
            stk_v(g2), stk_v(b2),
            stk_w(wfc), stk_v(bfc),
            stk_w(wp), stk_v(bp))


def transformer_forward(x_lne, packed, n_head, *, batch_tile=None):
    """Equivalent of Transformer.forward.  x_lne: [L, N, E] (torch seq-first)."""
    L, N, E = x_lne.shape
    n_layers = packed[0].shape[0]
    H = n_head

    md = packed[2].dtype                                   # matmul operand dtype
    md_bytes = jnp.dtype(md).itemsize
    io_dtype = md                                          # HBM-facing activation dtype
    io_bytes = jnp.dtype(io_dtype).itemsize

    Lp = ((L + 7) // 8) * 8                                # sublane-align sequence

    # per-layer weight bytes (what gets double-buffered per grid step)
    w_bytes = sum(int(a.size // n_layers) * a.dtype.itemsize for a in packed)

    # Physical VMEM minus headroom (v7x: 64 MiB -> ~48 MiB, v5e/v6e: 128 -> ~112 MiB).
    try:
        vmem_cap = int(pltpu.get_tpu_info().vmem_capacity_bytes)
    except Exception:                                      # conservative fallback
        vmem_cap = 64 * 1024 * 1024
    vmem_budget = max(vmem_cap - 16 * 1024 * 1024, 24 * 1024 * 1024)

    def vmem_needed(bt):
        """Conservative per-grid-step VMEM estimate (blocks + real intermediates)."""
        t = bt * Lp
        blocks = 2 * t * E * io_bytes + 2 * t * E * 4 + 2 * w_bytes
        carry = t * E * 4
        ln_qkv = t * E * (4 + md_bytes) + t * 3 * E * (4 + md_bytes)
        attn = (3 * t * E * md_bytes                       # qh/kh/vh
                + bt * H * Lp * Lp * (4 + md_bytes)        # scores f32 + p md
                + t * E * (4 + md_bytes))                  # attn out
        mlp = t * 4 * E * (4 + md_bytes) + t * E * 4       # h1 (f32+md) + h2
        return blocks + carry + ln_qkv + attn + mlp

    if batch_tile is None:
        # Weight-streaming roofline: need ~several hundred tokens per tile so the
        # per-layer weight DMA is hidden behind MXU work (≈240 v5e, ≈620-700 v6e/v7x).
        target_tokens = 640
        batch_tile = 1
        for bt in [d for d in range(1, N + 1) if N % d == 0]:
            if vmem_needed(bt) > vmem_budget:
                break
            batch_tile = bt
            if bt * Lp >= target_tokens:
                break
    Bt = batch_tile
    assert N % Bt == 0

    vmem_limit = int(vmem_budget)

    x_nle = jnp.transpose(x_lne, (1, 0, 2)).astype(io_dtype)   # [N, L, E]
    if Lp != L:
        x_nle = jnp.pad(x_nle, ((0, 0), (0, Lp - L), (0, 0)))  # [N, Lp, E]

    def wspec(arr):
        nz = arr.ndim - 1
        return pl.BlockSpec((1,) + arr.shape[1:],
                            lambda b, l, _nz=nz: (l,) + (0,) * _nz)

    in_specs = ([pl.BlockSpec((Bt, Lp, E), lambda b, l: (b, 0, 0))]
                + [wspec(a) for a in packed])
    out_specs = pl.BlockSpec((Bt, Lp, E), lambda b, l: (b, 0, 0))

    out = pl.pallas_call(
        partial(_fused_transformer_kernel, n_head=n_head, l_valid=L),
        out_shape=jax.ShapeDtypeStruct((N, Lp, E), jnp.float32),
        grid=(N // Bt, n_layers),
        in_specs=in_specs,
        out_specs=out_specs,
        scratch_shapes=[pltpu.VMEM((Bt * Lp, E), jnp.float32)],
        compiler_params=pltpu.CompilerParams(
            dimension_semantics=("parallel", "arbitrary"),
            vmem_limit_bytes=vmem_limit),
    )(x_nle, *packed)

    out = out[:, :L, :]                                    # drop padded rows
    return jnp.transpose(out, (1, 0, 2))                   # back to [L, N, E]


# ----------------------- parameter init (torch convention) --------------------
def init_params(key, width, layers):
    params = []
    for i in range(layers):
        ks = jax.random.split(jax.random.fold_in(key, i), 8)
        nrm = lambda k, shape, std=0.02: jax.random.normal(k, shape, jnp.float32) * std
        p = (
            jnp.ones((width,), jnp.float32),              # ln_1.weight
            jnp.zeros((width,), jnp.float32),             # ln_1.bias
            nrm(ks[0], (3 * width, width)),               # attn.in_proj_weight
            nrm(ks[1], (3 * width,), 0.01),               # attn.in_proj_bias
            nrm(ks[2], (width, width)),                   # attn.out_proj.weight
            nrm(ks[3], (width,), 0.01),                   # attn.out_proj.bias
            jnp.ones((width,), jnp.float32),              # ln_2.weight
            jnp.zeros((width,), jnp.float32),             # ln_2.bias
            nrm(ks[4], (4 * width, width)),               # mlp.c_fc.weight
            nrm(ks[5], (4 * width,), 0.01),               # mlp.c_fc.bias
            nrm(ks[6], (width, 4 * width)),               # mlp.c_proj.weight
            nrm(ks[7], (width,), 0.01),                   # mlp.c_proj.bias
        )
        params.append(p)
    return params


# ----------------------------- pure-JAX reference -----------------------------
def _ref_block(x, p, n_head):                              # x: [N, L, E]
    g1, b1, wqkv, bqkv, wo, bo, g2, b2, wfc, bfc, wp, bp = p

    def ln(y, g, b):
        mu = y.mean(-1, keepdims=True)
        var = ((y - mu) ** 2).mean(-1, keepdims=True)
        return (y - mu) / jnp.sqrt(var + _EPS) * g + b

    N, L, E = x.shape
    dh = E // n_head
    xn = ln(x, g1, b1)
    qkv = xn @ wqkv.T + bqkv
    q, k, v = qkv[..., :E], qkv[..., E:2 * E], qkv[..., 2 * E:]
    q = q.reshape(N, L, n_head, dh).transpose(0, 2, 1, 3) / math.sqrt(dh)
    k = k.reshape(N, L, n_head, dh).transpose(0, 2, 1, 3)
    v = v.reshape(N, L, n_head, dh).transpose(0, 2, 1, 3)
    s = q @ jnp.swapaxes(k, -1, -2)
    a = jax.nn.softmax(s, axis=-1)
    o = (a @ v).transpose(0, 2, 1, 3).reshape(N, L, E)
    x = x + o @ wo.T + bo
    xn2 = ln(x, g2, b2)
    h = xn2 @ wfc.T + bfc
    h = h * jax.nn.sigmoid(1.702 * h)
    return x + h @ wp.T + bp


def _ref_transformer(x_lne, params, n_head):
    x = jnp.transpose(x_lne, (1, 0, 2))
    for p in params:
        x = _ref_block(x, p, n_head)
    return jnp.transpose(x, (1, 0, 2))


if __name__ == "__main__":
    # Small config: width=32, layers=2, heads=4, seq=12 (pads to 16), batch=2.
    width, layers, heads = 32, 2, 4
    seq_len, batch = 12, 2

    key = jax.random.PRNGKey(0)
    k_x, k_p = jax.random.split(key)
    x = jax.random.normal(k_x, (seq_len, batch, width), jnp.float32)   # [L, N, E]
    params = init_params(k_p, width, layers)

    ref = jax.block_until_ready(_ref_transformer(x, params, heads))

    # Recommended config: bf16 matmul operands / bf16 HBM activations, f32 accumulation.
    packed_bf16 = pack_params(params, heads, matmul_dtype=jnp.bfloat16)
    out_bf16 = jax.block_until_ready(transformer_forward(x, packed_bf16, heads))
    assert out_bf16.shape == (seq_len, batch, width)
    assert jnp.allclose(out_bf16, ref, atol=5e-2, rtol=5e-2), \
        "bf16 kernel mismatch vs reference"

    # f32 matmul operands for a tight numerical check of the kernel structure
    # (also exercises the seq-padding / key-mask path).
    packed_f32 = pack_params(params, heads, matmul_dtype=jnp.float32)
    out_f32 = jax.block_until_ready(transformer_forward(x, packed_f32, heads))
    assert jnp.allclose(out_f32, ref, atol=2e-3, rtol=2e-3), \
        "f32 kernel mismatch vs reference"

    print("KERNEL_OK")
</pallas_src>

<mosaic_0001>
module attributes {stable_mosaic.version = 11 : i64} {
  func.func @_fused_transformer_kernel(%arg0: i32, %arg1: i32, %arg2: memref<2x16x32xbf16, #tpu.memory_space<vmem>>, %arg3: memref<1x1x32xf32, #tpu.memory_space<vmem>>, %arg4: memref<1x1x32xf32, #tpu.memory_space<vmem>>, %arg5: memref<1x32x96xbf16, #tpu.memory_space<vmem>>, %arg6: memref<1x1x96xf32, #tpu.memory_space<vmem>>, %arg7: memref<1x32x32xbf16, #tpu.memory_space<vmem>>, %arg8: memref<1x1x32xf32, #tpu.memory_space<vmem>>, %arg9: memref<1x1x32xf32, #tpu.memory_space<vmem>>, %arg10: memref<1x1x32xf32, #tpu.memory_space<vmem>>, %arg11: memref<1x32x128xbf16, #tpu.memory_space<vmem>>, %arg12: memref<1x1x128xf32, #tpu.memory_space<vmem>>, %arg13: memref<1x128x32xbf16, #tpu.memory_space<vmem>>, %arg14: memref<1x1x32xf32, #tpu.memory_space<vmem>>, %arg15: memref<2x16x32xf32, #tpu.memory_space<vmem>>, %arg16: memref<32x32xf32, #tpu.memory_space<vmem>>) attributes {dimension_semantics = [#tpu.dimension_semantics<parallel>, #tpu.dimension_semantics<arbitrary>], iteration_bounds = array<i64: 1, 2>, scalar_prefetch = 0 : i64, scratch_operands = 1 : i64, tpu.core_type = #tpu.core_type<tc>, window_params = [{transform_indices = @transform_0, window_bounds = array<i64: 2, 16, 32>}, {transform_indices = @transform_1, window_bounds = array<i64: 1, 1, 32>}, {transform_indices = @transform_2, window_bounds = array<i64: 1, 1, 32>}, {transform_indices = @transform_3, window_bounds = array<i64: 1, 32, 96>}, {transform_indices = @transform_4, window_bounds = array<i64: 1, 1, 96>}, {transform_indices = @transform_5, window_bounds = array<i64: 1, 32, 32>}, {transform_indices = @transform_6, window_bounds = array<i64: 1, 1, 32>}, {transform_indices = @transform_7, window_bounds = array<i64: 1, 1, 32>}, {transform_indices = @transform_8, window_bounds = array<i64: 1, 1, 32>}, {transform_indices = @transform_9, window_bounds = array<i64: 1, 32, 128>}, {transform_indices = @transform_10, window_bounds = array<i64: 1, 1, 128>}, {transform_indices = @transform_11, window_bounds = array<i64: 1, 128, 32>}, {transform_indices = @transform_12, window_bounds = array<i64: 1, 1, 32>}, {transform_indices = @transform_13, window_bounds = array<i64: 2, 16, 32>}]} {
    %c0_i32 = arith.constant 0 : i32
    %0 = arith.cmpi eq, %arg1, %c0_i32 : i32
    %1 = arith.extui %0 : i1 to i32
    %c0_i32_0 = arith.constant 0 : i32
    %2 = arith.cmpi ne, %1, %c0_i32_0 : i32
    scf.if %2 {
      %c0_61 = arith.constant 0 : index
      %c0_62 = arith.constant 0 : index
      %c0_63 = arith.constant 0 : index
      %137 = vector.load %arg2[%c0_61, %c0_62, %c0_63] : memref<2x16x32xbf16, #tpu.memory_space<vmem>>, vector<2x16x32xbf16>
      %138 = arith.extf %137 : vector<2x16x32xbf16> to vector<2x16x32xf32>
      %139 = vector.shape_cast %138 : vector<2x16x32xf32> to vector<32x32xf32>
      %c0_64 = arith.constant 0 : index
      %c0_65 = arith.constant 0 : index
      %140 = vector.load %arg16[%c0_64, %c0_65] : memref<32x32xf32, #tpu.memory_space<vmem>>, vector<32x32xf32>
      tpu.vector_store %arg16[%c0_64, %c0_65], %139 {strides = array<i32>} : memref<32x32xf32, #tpu.memory_space<vmem>>, vector<32x32xf32>,
    } else {
    }
    %c0 = arith.constant 0 : index
    %c0_1 = arith.constant 0 : index
    %3 = vector.load %arg16[%c0, %c0_1] : memref<32x32xf32, #tpu.memory_space<vmem>>, vector<32x32xf32>
    %cst = arith.constant dense<0.000000e+00> : vector<32xf32>
    %4 = vector.multi_reduction <add>, %3, %cst [1] : vector<32x32xf32> to vector<32xf32>
    %5 = vector.shape_cast %4 : vector<32xf32> to vector<32x1xf32>
    %cst_2 = arith.constant 3.200000e+01 : f32
    %6 = vector.broadcast %cst_2 : f32 to vector<32x1xf32>
    %7 = arith.divf %5, %6 : vector<32x1xf32>
    %8 = vector.broadcast %7 : vector<32x1xf32> to vector<32x32xf32>
    %9 = arith.subf %3, %8 : vector<32x32xf32>
    %10 = arith.mulf %9, %9 : vector<32x32xf32>
    %cst_3 = arith.constant dense<0.000000e+00> : vector<32xf32>
    %11 = vector.multi_reduction <add>, %10, %cst_3 [1] : vector<32x32xf32> to vector<32xf32>
    %12 = vector.shape_cast %11 : vector<32xf32> to vector<32x1xf32>
    %cst_4 = arith.constant 3.200000e+01 : f32
    %13 = vector.broadcast %cst_4 : f32 to vector<32x1xf32>
    %14 = arith.divf %12, %13 : vector<32x1xf32>
    %cst_5 = arith.constant 9.99999974E-6 : f32
    %15 = vector.broadcast %cst_5 : f32 to vector<32x1xf32>
    %16 = arith.addf %14, %15 : vector<32x1xf32>
    %17 = math.rsqrt %16 : vector<32x1xf32>
    %18 = vector.broadcast %17 : vector<32x1xf32> to vector<32x32xf32>
    %19 = arith.mulf %9, %18 : vector<32x32xf32>
    %c0_6 = arith.constant 0 : index
    %c0_7 = arith.constant 0 : index
    %c0_8 = arith.constant 0 : index
    %20 = vector.load %arg3[%c0_6, %c0_7, %c0_8] : memref<1x1x32xf32, #tpu.memory_space<vmem>>, vector<1x1x32xf32>
    %21 = vector.shape_cast %20 : vector<1x1x32xf32> to vector<1x32xf32>
    %22 = vector.broadcast %21 : vector<1x32xf32> to vector<32x32xf32>
    %23 = arith.mulf %19, %22 : vector<32x32xf32>
    %c0_9 = arith.constant 0 : index
    %c0_10 = arith.constant 0 : index
    %c0_11 = arith.constant 0 : index
    %24 = vector.load %arg4[%c0_9, %c0_10, %c0_11] : memref<1x1x32xf32, #tpu.memory_space<vmem>>, vector<1x1x32xf32>
    %25 = vector.shape_cast %24 : vector<1x1x32xf32> to vector<1x32xf32>
    %26 = vector.broadcast %25 : vector<1x32xf32> to vector<32x32xf32>
    %27 = arith.addf %23, %26 : vector<32x32xf32>
    %28 = arith.truncf %27 : vector<32x32xf32> to vector<32x32xbf16>
    %c0_12 = arith.constant 0 : index
    %c0_13 = arith.constant 0 : index
    %c0_14 = arith.constant 0 : index
    %29 = vector.load %arg5[%c0_12, %c0_13, %c0_14] : memref<1x32x96xbf16, #tpu.memory_space<vmem>>, vector<1x32x96xbf16>
    %30 = vector.shape_cast %29 : vector<1x32x96xbf16> to vector<32x96xbf16>
    %cst_15 = arith.constant dense<0.000000e+00> : vector<32x96xf32>
    %31 = tpu.matmul %28, %30, %cst_15 {dimension_numbers = #tpu.dot_dimension_numbers<[1], [0], [0], [1], [0, 0, 1, 1], [], []>} : vector<32x32xbf16>, vector<32x96xbf16>, vector<32x96xf32> -> vector<32x96xf32>
    %c0_16 = arith.constant 0 : index
    %c0_17 = arith.constant 0 : index
    %c0_18 = arith.constant 0 : index
    %32 = vector.load %arg6[%c0_16, %c0_17, %c0_18] : memref<1x1x96xf32, #tpu.memory_space<vmem>>, vector<1x1x96xf32>
    %33 = vector.shape_cast %32 : vector<1x1x96xf32> to vector<1x96xf32>
    %34 = vector.broadcast %33 : vector<1x96xf32> to vector<32x96xf32>
    %35 = arith.addf %31, %34 : vector<32x96xf32>
    %36 = vector.extract_strided_slice %35 {offsets = [0, 0], sizes = [32, 32], strides = [1, 1]} : vector<32x96xf32> to vector<32x32xf32>
    %37 = arith.truncf %36 : vector<32x32xf32> to vector<32x32xbf16>
    %38 = vector.shape_cast %37 : vector<32x32xbf16> to vector<2x16x4x8xbf16>
    %39 = tpu.transpose %38, [0, 2, 1, 3] : vector<2x16x4x8xbf16> -> vector<2x4x16x8xbf16>
    %40 = vector.shape_cast %39 : vector<2x4x16x8xbf16> to vector<8x16x8xbf16>
    %41 = vector.extract_strided_slice %35 {offsets = [0, 32], sizes = [32, 32], strides = [1, 1]} : vector<32x96xf32> to vector<32x32xf32>
    %42 = arith.truncf %41 : vector<32x32xf32> to vector<32x32xbf16>
    %43 = vector.shape_cast %42 : vector<32x32xbf16> to vector<2x16x4x8xbf16>
    %44 = tpu.transpose %43, [0, 2, 1, 3] : vector<2x16x4x8xbf16> -> vector<2x4x16x8xbf16>
    %45 = vector.shape_cast %44 : vector<2x4x16x8xbf16> to vector<8x16x8xbf16>
    %46 = vector.extract_strided_slice %35 {offsets = [0, 64], sizes = [32, 32], strides = [1, 1]} : vector<32x96xf32> to vector<32x32xf32>
    %47 = arith.truncf %46 : vector<32x32xf32> to vector<32x32xbf16>
    %48 = vector.shape_cast %47 : vector<32x32xbf16> to vector<2x16x4x8xbf16>
    %49 = tpu.transpose %48, [0, 2, 1, 3] : vector<2x16x4x8xbf16> -> vector<2x4x16x8xbf16>
    %50 = vector.shape_cast %49 : vector<2x4x16x8xbf16> to vector<8x16x8xbf16>
    "tpu.trace_start"() <{level = 10 : i32, message = "bqd,bkd->bqk"}> : () -> ()
    %cst_19 = arith.constant dense<0.000000e+00> : vector<8x16x16xf32>
    %51 = tpu.matmul %40, %45, %cst_19 {dimension_numbers = #tpu.dot_dimension_numbers<[2], [2], [1], [1], [0, 0, 0, 1, 1, 1], [0], [0]>} : vector<8x16x8xbf16>, vector<8x16x8xbf16>, vector<8x16x16xf32> -> vector<8x16x16xf32>
    "tpu.trace_stop"() : () -> ()
    %52 = tpu.iota {dimensions = array<i32: 2>} : vector<1x1x16xi32>
    %c12_i32 = arith.constant 12 : i32
    %53 = vector.broadcast %c12_i32 : i32 to vector<1x1x16xi32>
    %54 = arith.cmpi slt, %52, %53 : vector<1x1x16xi32>
    %cst_20 = arith.constant -1.000000e+30 : f32
    %55 = vector.shape_cast %54 : vector<1x1x16xi1> to vector<1x1x16xi1>
    %56 = vector.broadcast %55 : vector<1x1x16xi1> to vector<8x16x16xi1>
    %57 = vector.broadcast %cst_20 : f32 to vector<8x16x16xf32>
    %58 = arith.select %56, %51, %57 : vector<8x16x16xi1>, vector<8x16x16xf32>
    %cst_21 = arith.constant dense<0xFF800000> : vector<8x16xf32>
    %59 = vector.multi_reduction <maximumf>, %58, %cst_21 [2] : vector<8x16x16xf32> to vector<8x16xf32>
    %60 = vector.shape_cast %59 : vector<8x16xf32> to vector<8x16x1xf32>
    %61 = vector.broadcast %60 : vector<8x16x1xf32> to vector<8x16x16xf32>
    %62 = arith.subf %58, %61 : vector<8x16x16xf32>
    %63 = arith.truncf %62 : vector<8x16x16xf32> to vector<8x16x16xbf16>
    %64 = math.exp %63 : vector<8x16x16xbf16>
    %65 = arith.extf %64 : vector<8x16x16xbf16> to vector<8x16x16xf32>
    %cst_22 = arith.constant dense<0.000000e+00> : vector<8x16xf32>
    %66 = vector.multi_reduction <add>, %65, %cst_22 [2] : vector<8x16x16xf32> to vector<8x16xf32>
    %67 = vector.shape_cast %66 : vector<8x16xf32> to vector<8x16x1xf32>
    "tpu.trace_start"() <{level = 10 : i32, message = "bqk,bkd->bqd"}> : () -> ()
    %cst_23 = arith.constant dense<0.000000e+00> : vector<8x16x8xf32>
    %68 = tpu.matmul %64, %50, %cst_23 {dimension_numbers = #tpu.dot_dimension_numbers<[2], [1], [1], [2], [0, 0, 0, 1, 1, 2], [0], [0]>} : vector<8x16x16xbf16>, vector<8x16x8xbf16>, vector<8x16x8xf32> -> vector<8x16x8xf32>
    "tpu.trace_stop"() : () -> ()
    %69 = tpu.reciprocal %67 {approx = true} : vector<8x16x1xf32> -> vector<8x16x1xf32>
    %70 = vector.broadcast %69 : vector<8x16x1xf32> to vector<8x16x8xf32>
    %71 = arith.mulf %68, %70 : vector<8x16x8xf32>
    %72 = arith.truncf %71 : vector<8x16x8xf32> to vector<8x16x8xbf16>
    %73 = vector.shape_cast %72 : vector<8x16x8xbf16> to vector<2x4x16x8xbf16>
    %74 = tpu.transpose %73, [0, 2, 1, 3] : vector<2x4x16x8xbf16> -> vector<2x16x4x8xbf16>
    %75 = vector.shape_cast %74 : vector<2x16x4x8xbf16> to vector<32x32xbf16>
    %c0_24 = arith.constant 0 : index
    %c0_25 = arith.constant 0 : index
    %c0_26 = arith.constant 0 : index
    %76 = vector.load %arg7[%c0_24, %c0_25, %c0_26] : memref<1x32x32xbf16, #tpu.memory_space<vmem>>, vector<1x32x32xbf16>
    %77 = vector.shape_cast %76 : vector<1x32x32xbf16> to vector<32x32xbf16>
    %cst_27 = arith.constant dense<0.000000e+00> : vector<32x32xf32>
    %78 = tpu.matmul %75, %77, %cst_27 {dimension_numbers = #tpu.dot_dimension_numbers<[1], [0], [0], [1], [0, 0, 1, 1], [], []>} : vector<32x32xbf16>, vector<32x32xbf16>, vector<32x32xf32> -> vector<32x32xf32>
    %c0_28 = arith.constant 0 : index
    %c0_29 = arith.constant 0 : index
    %c0_30 = arith.constant 0 : index
    %79 = vector.load %arg8[%c0_28, %c0_29, %c0_30] : memref<1x1x32xf32, #tpu.memory_space<vmem>>, vector<1x1x32xf32>
    %80 = vector.shape_cast %79 : vector<1x1x32xf32> to vector<1x32xf32>
    %81 = vector.broadcast %80 : vector<1x32xf32> to vector<32x32xf32>
    %82 = arith.addf %78, %81 : vector<32x32xf32>
    %83 = arith.addf %3, %82 : vector<32x32xf32>
    %cst_31 = arith.constant dense<0.000000e+00> : vector<32xf32>
    %84 = vector.multi_reduction <add>, %83, %cst_31 [1] : vector<32x32xf32> to vector<32xf32>
    %85 = vector.shape_cast %84 : vector<32xf32> to vector<32x1xf32>
    %cst_32 = arith.constant 3.200000e+01 : f32
    %86 = vector.broadcast %cst_32 : f32 to vector<32x1xf32>
    %87 = arith.divf %85, %86 : vector<32x1xf32>
    %88 = vector.broadcast %87 : vector<32x1xf32> to vector<32x32xf32>
    %89 = arith.subf %83, %88 : vector<32x32xf32>
    %90 = arith.mulf %89, %89 : vector<32x32xf32>
    %cst_33 = arith.constant dense<0.000000e+00> : vector<32xf32>
    %91 = vector.multi_reduction <add>, %90, %cst_33 [1] : vector<32x32xf32> to vector<32xf32>
    %92 = vector.shape_cast %91 : vector<32xf32> to vector<32x1xf32>
    %cst_34 = arith.constant 3.200000e+01 : f32
    %93 = vector.broadcast %cst_34 : f32 to vector<32x1xf32>
    %94 = arith.divf %92, %93 : vector<32x1xf32>
    %cst_35 = arith.constant 9.99999974E-6 : f32
    %95 = vector.broadcast %cst_35 : f32 to vector<32x1xf32>
    %96 = arith.addf %94, %95 : vector<32x1xf32>
    %97 = math.rsqrt %96 : vector<32x1xf32>
    %98 = vector.broadcast %97 : vector<32x1xf32> to vector<32x32xf32>
    %99 = arith.mulf %89, %98 : vector<32x32xf32>
    %c0_36 = arith.constant 0 : index
    %c0_37 = arith.constant 0 : index
    %c0_38 = arith.constant 0 : index
    %100 = vector.load %arg9[%c0_36, %c0_37, %c0_38] : memref<1x1x32xf32, #tpu.memory_space<vmem>>, vector<1x1x32xf32>
    %101 = vector.shape_cast %100 : vector<1x1x32xf32> to vector<1x32xf32>
    %102 = vector.broadcast %101 : vector<1x32xf32> to vector<32x32xf32>
    %103 = arith.mulf %99, %102 : vector<32x32xf32>
    %c0_39 = arith.constant 0 : index
    %c0_40 = arith.constant 0 : index
    %c0_41 = arith.constant 0 : index
    %104 = vector.load %arg10[%c0_39, %c0_40, %c0_41] : memref<1x1x32xf32, #tpu.memory_space<vmem>>, vector<1x1x32xf32>
    %105 = vector.shape_cast %104 : vector<1x1x32xf32> to vector<1x32xf32>
    %106 = vector.broadcast %105 : vector<1x32xf32> to vector<32x32xf32>
    %107 = arith.addf %103, %106 : vector<32x32xf32>
    %108 = arith.truncf %107 : vector<32x32xf32> to vector<32x32xbf16>
    %c0_42 = arith.constant 0 : index
    %c0_43 = arith.constant 0 : index
    %c0_44 = arith.constant 0 : index
    %109 = vector.load %arg11[%c0_42, %c0_43, %c0_44] : memref<1x32x128xbf16, #tpu.memory_space<vmem>>, vector<1x32x128xbf16>
    %110 = vector.shape_cast %109 : vector<1x32x128xbf16> to vector<32x128xbf16>
    %cst_45 = arith.constant dense<0.000000e+00> : vector<32x128xf32>
    %111 = tpu.matmul %108, %110, %cst_45 {dimension_numbers = #tpu.dot_dimension_numbers<[1], [0], [0], [1], [0, 0, 1, 1], [], []>} : vector<32x32xbf16>, vector<32x128xbf16>, vector<32x128xf32> -> vector<32x128xf32>
    %c0_46 = arith.constant 0 : index
    %c0_47 = arith.constant 0 : index
    %c0_48 = arith.constant 0 : index
    %112 = vector.load %arg12[%c0_46, %c0_47, %c0_48] : memref<1x1x128xf32, #tpu.memory_space<vmem>>, vector<1x1x128xf32>
    %113 = vector.shape_cast %112 : vector<1x1x128xf32> to vector<1x128xf32>
    %114 = vector.broadcast %113 : vector<1x128xf32> to vector<32x128xf32>
    %115 = arith.addf %111, %114 : vector<32x128xf32>
    %cst_49 = arith.constant 1.702000e+00 : f32
    %116 = vector.broadcast %cst_49 : f32 to vector<32x128xf32>
    %117 = arith.mulf %116, %115 : vector<32x128xf32>
    %118 = arith.negf %117 : vector<32x128xf32>
    %119 = math.exp %118 : vector<32x128xf32>
    %cst_50 = arith.constant 1.000000e+00 : f32
    %120 = vector.broadcast %cst_50 : f32 to vector<32x128xf32>
    %121 = arith.addf %120, %119 : vector<32x128xf32>
    %122 = arith.divf %120, %121 : vector<32x128xf32>
    %123 = arith.mulf %115, %122 : vector<32x128xf32>
    %124 = arith.truncf %123 : vector<32x128xf32> to vector<32x128xbf16>
    %c0_51 = arith.constant 0 : index
    %c0_52 = arith.constant 0 : index
    %c0_53 = arith.constant 0 : index
    %125 = vector.load %arg13[%c0_51, %c0_52, %c0_53] : memref<1x128x32xbf16, #tpu.memory_space<vmem>>, vector<1x128x32xbf16>
    %126 = vector.shape_cast %125 : vector<1x128x32xbf16> to vector<128x32xbf16>
    %cst_54 = arith.constant dense<0.000000e+00> : vector<32x32xf32>
    %127 = tpu.matmul %124, %126, %cst_54 {dimension_numbers = #tpu.dot_dimension_numbers<[1], [0], [0], [1], [0, 0, 1, 1], [], []>} : vector<32x128xbf16>, vector<128x32xbf16>, vector<32x32xf32> -> vector<32x32xf32>
    %c0_55 = arith.constant 0 : index
    %c0_56 = arith.constant 0 : index
    %c0_57 = arith.constant 0 : index
    %128 = vector.load %arg14[%c0_55, %c0_56, %c0_57] : memref<1x1x32xf32, #tpu.memory_space<vmem>>, vector<1x1x32xf32>
    %129 = vector.shape_cast %128 : vector<1x1x32xf32> to vector<1x32xf32>
    %130 = vector.broadcast %129 : vector<1x32xf32> to vector<32x32xf32>
    %131 = arith.addf %127, %130 : vector<32x32xf32>
    %132 = arith.addf %83, %131 : vector<32x32xf32>
    %c0_58 = arith.constant 0 : index
    %c0_59 = arith.constant 0 : index
    %133 = vector.load %arg16[%c0_58, %c0_59] : memref<32x32xf32, #tpu.memory_space<vmem>>, vector<32x32xf32>
    tpu.vector_store %arg16[%c0_58, %c0_59], %132 {strides = array<i32>} : memref<32x32xf32, #tpu.memory_space<vmem>>, vector<32x32xf32>,
    %c1_i32 = arith.constant 1 : i32
    %134 = arith.cmpi eq, %arg1, %c1_i32 : i32
    %135 = arith.extui %134 : i1 to i32
    %c0_i32_60 = arith.constant 0 : i32
    %136 = arith.cmpi ne, %135, %c0_i32_60 : i32
    scf.if %136 {
      %137 = vector.shape_cast %132 : vector<32x32xf32> to vector<2x16x32xf32>
      %c0_61 = arith.constant 0 : index
      %c0_62 = arith.constant 0 : index
      %c0_63 = arith.constant 0 : index
      %138 = vector.load %arg15[%c0_61, %c0_62, %c0_63] : memref<2x16x32xf32, #tpu.memory_space<vmem>>, vector<2x16x32xf32>
      tpu.vector_store %arg15[%c0_61, %c0_62, %c0_63], %137 {strides = array<i32>} : memref<2x16x32xf32, #tpu.memory_space<vmem>>, vector<2x16x32xf32>,
    } else {
    }
    return
  }
  func.func @transform_0(%arg0: i32, %arg1: i32) -> (i32, i32, i32) {
    %c0_i32 = arith.constant 0 : i32
    %c0_i32_0 = arith.constant 0 : i32
    %c0_i32_1 = arith.constant 0 : i32
    return %arg0, %c0_i32, %c0_i32_0 : i32, i32, i32
  }
  func.func @transform_1(%arg0: i32, %arg1: i32) -> (i32, i32, i32) {
    %c0_i32 = arith.constant 0 : i32
    %c0_i32_0 = arith.constant 0 : i32
    %c0_i32_1 = arith.constant 0 : i32
    return %arg1, %c0_i32, %c0_i32_0 : i32, i32, i32
  }
  func.func @transform_2(%arg0: i32, %arg1: i32) -> (i32, i32, i32) {
    %c0_i32 = arith.constant 0 : i32
    %c0_i32_0 = arith.constant 0 : i32
    %c0_i32_1 = arith.constant 0 : i32
    return %arg1, %c0_i32, %c0_i32_0 : i32, i32, i32
  }
  func.func @transform_3(%arg0: i32, %arg1: i32) -> (i32, i32, i32) {
    %c0_i32 = arith.constant 0 : i32
    %c0_i32_0 = arith.constant 0 : i32
    %c0_i32_1 = arith.constant 0 : i32
    return %arg1, %c0_i32, %c0_i32_0 : i32, i32, i32
  }
  func.func @transform_4(%arg0: i32, %arg1: i32) -> (i32, i32, i32) {
    %c0_i32 = arith.constant 0 : i32
    %c0_i32_0 = arith.constant 0 : i32
    %c0_i32_1 = arith.constant 0 : i32
    return %arg1, %c0_i32, %c0_i32_0 : i32, i32, i32
  }
  func.func @transform_5(%arg0: i32, %arg1: i32) -> (i32, i32, i32) {
    %c0_i32 = arith.constant 0 : i32
    %c0_i32_0 = arith.constant 0 : i32
    %c0_i32_1 = arith.constant 0 : i32
    return %arg1, %c0_i32, %c0_i32_0 : i32, i32, i32
  }
  func.func @transform_6(%arg0: i32, %arg1: i32) -> (i32, i32, i32) {
    %c0_i32 = arith.constant 0 : i32
    %c0_i32_0 = arith.constant 0 : i32
    %c0_i32_1 = arith.constant 0 : i32
    return %arg1, %c0_i32, %c0_i32_0 : i32, i32, i32
  }
  func.func @transform_7(%arg0: i32, %arg1: i32) -> (i32, i32, i32) {
    %c0_i32 = arith.constant 0 : i32
    %c0_i32_0 = arith.constant 0 : i32
    %c0_i32_1 = arith.constant 0 : i32
    return %arg1, %c0_i32, %c0_i32_0 : i32, i32, i32
  }
  func.func @transform_8(%arg0: i32, %arg1: i32) -> (i32, i32, i32) {
    %c0_i32 = arith.constant 0 : i32
    %c0_i32_0 = arith.constant 0 : i32
    %c0_i32_1 = arith.constant 0 : i32
    return %arg1, %c0_i32, %c0_i32_0 : i32, i32, i32
  }
  func.func @transform_9(%arg0: i32, %arg1: i32) -> (i32, i32, i32) {
    %c0_i32 = arith.constant 0 : i32
    %c0_i32_0 = arith.constant 0 : i32
    %c0_i32_1 = arith.constant 0 : i32
    return %arg1, %c0_i32, %c0_i32_0 : i32, i32, i32
  }
  func.func @transform_10(%arg0: i32, %arg1: i32) -> (i32, i32, i32) {
    %c0_i32 = arith.constant 0 : i32
    %c0_i32_0 = arith.constant 0 : i32
    %c0_i32_1 = arith.constant 0 : i32
    return %arg1, %c0_i32, %c0_i32_0 : i32, i32, i32
  }
  func.func @transform_11(%arg0: i32, %arg1: i32) -> (i32, i32, i32) {
    %c0_i32 = arith.constant 0 : i32
    %c0_i32_0 = arith.constant 0 : i32
    %c0_i32_1 = arith.constant 0 : i32
    return %arg1, %c0_i32, %c0_i32_0 : i32, i32, i32
  }
  func.func @transform_12(%arg0: i32, %arg1: i32) -> (i32, i32, i32) {
    %c0_i32 = arith.constant 0 : i32
    %c0_i32_0 = arith.constant 0 : i32
    %c0_i32_1 = arith.constant 0 : i32
    return %arg1, %c0_i32, %c0_i32_0 : i32, i32, i32
  }
  func.func @transform_13(%arg0: i32, %arg1: i32) -> (i32, i32, i32) {
    %c0_i32 = arith.constant 0 : i32
    %c0_i32_0 = arith.constant 0 : i32
    %c0_i32_1 = arith.constant 0 : i32
    return %arg0, %c0_i32, %c0_i32_0 : i32, i32, i32
  }
}

</mosaic_0001>

<bundles_post_ra>
// kernel: tpu_custom_call.1
= control target key start
LH: loop header
LB: loop body
LE: loop exit
PB: predicated region body
PF: predicated region fallthrough
CT: control target
= control target key end

     0   :  { %s6058_s0 = inlined_call_operand.vmem [shape: bf16[2,16,32], index: 0, kind: input, shape index: {}]   ;;  %s6059_s1 = inlined_call_operand.vmem [shape: f32[2,1,32], index: 1, kind: input, shape index: {}]   ;;  %s6060_s2 = inlined_call_operand.vmem [shape: f32[2,1,32], index: 2, kind: input, shape index: {}]   ;;  %s6061_s3 = inlined_call_operand.vmem [shape: bf16[2,32,96], index: 3, kind: input, shape index: {}]   ;;  %s6062_s4 = inlined_call_operand.vmem [shape: f32[2,1,96], index: 4, kind: input, shape index: {}]   ;;  %s6063_s5 = inlined_call_operand.vmem [shape: bf16[2,32,32], index: 5, kind: input, shape index: {}]   ;;  %s6064_s6 = inlined_call_operand.vmem [shape: f32[2,1,32], index: 6, kind: input, shape index: {}]   ;;  %s6065_s7 = inlined_call_operand.vmem [shape: f32[2,1,32], index: 7, kind: input, shape index: {}]   ;;  %s6066_s8 = inlined_call_operand.vmem [shape: f32[2,1,32], index: 8, kind: input, shape index: {}]   ;;  %s6067_s9 = inlined_call_operand.vmem [shape: bf16[2,32,128], index: 9, kind: input, shape index: {}]   ;;  %s6068_s10 = inlined_call_operand.vmem [shape: f32[2,1,128], index: 10, kind: input, shape index: {}]   ;;  %s6069_s11 = inlined_call_operand.vmem [shape: bf16[2,128,32], index: 11, kind: input, shape index: {}]   ;;  %s6070_s12 = inlined_call_operand.vmem [shape: f32[2,1,32], index: 12, kind: input, shape index: {}]   ;;  %s6071_s13 = inlined_call_operand.hbm [shape: f32[2,16,32], index: 13, kind: output, shape index: {}]  }
   0x1   :  { %6076 = sst [smem:[#allocation10_spill]] %s6061_s3 }
   0x2   :  { %6077 = sst [smem:[#allocation11_spill]] %s6063_s5 }
   0x3   :  { %6078 = sst [smem:[#allocation12_spill]] %s6071_s13 }
   0x4   :  { %18 = vsyncpa [#allocation4], 0  ;;  %s5118_s25 = smov 0   ;;  %s5120_s26 = smov 0  }
   0x5   :  { %s5122_s27 = smov 0  }
   0x6 LB: > { %6079 = sst [smem:[#allocation6_spill]] %s5027_s26  ;;  %s33_s29 = sadd.s32 1, %s5027_s26  ;;  %s5031_s27 = sphi %s5122_s27, %s24_s27   ;;  %s5027_s26 = sphi %s5120_s26, %s6096_s26   ;;  %s5023_s25 = sphi %s5118_s25, %s6095_s25  }
   0x7   : > { %6080 = sst [smem:[#allocation7_spill]] %s5031_s27  ;;  %p34_p0 = scmp.ge.s32.totalorder %s33_s29, 2 }
   0x8   : > { %p4534_p1 = scmp.ge.s32.totalorder %s5031_s27, 1  ;;  %p506_p2 = scmp.lt.s32.totalorder %s5031_s27, 3 }
   0x9   : > { %s6098_s29 = smov (%p34_p0, %s33_s29), 0 }
   0xa   : > { %6081 = sst [smem:[#allocation8_spill]] %s6098_s29  ;;  %p507_p3 = pnand %p4534_p1, %p506_p2 }
   0xc   : > { %510 = sbr.rel (%p507_p3) target bundleno = 2720 (0xaa0), region = 72 }
  0x13   : > { %p597_p4 = scmp.lt.s32.totalorder %s5023_s25, 1  ;;  %s6082_s3 = sld [smem:[#allocation10_spill]] }
  0x14   : > { %s6083_s5 = sld [smem:[#allocation11_spill]]  ;;  %p4543_p5 = scmp.ne.s32.totalorder %s5023_s25, 0 }
  0x15   : > { %s5141_s30 = scalar_select %p597_p4, %s5023_s25, 1 }
  0x16   : > { %646 = sbr.rel (%p4543_p5) target bundleno = 29 (0x1d), region = 76  ;;  %v4634_v0 = vld [vmem:[%s6058_s0] sm:$0xff] (!%p4543_p5)   ;;  %vm655_vm0 = vcmask (!%p4543_p5), 261120   ;;  %v4641_v1 = vld [vmem:[%s6058_s0 + $0x8] sm:$0xff] (!%p4543_p5)  }
  0x17   : > { %s4629_s20 = sshll.u32 %s5141_s30, 4  ;;  %s621_s27 = scalar_lea.vmem %s6065_s7, %s5141_s30  ;;  %v4635_v2 = vunpack.c.l.bf16 (!%p4543_p5), %v4634_v0  ;;  %v4636_v3 = vunpack.c.h.bf16 (!%p4543_p5), %v4634_v0  ;;  %v4639_v4 = vunpack.c.l.bf16 (!%p4543_p5), %v4641_v1  ;;  %v4640_v5 = vunpack.c.h.bf16 (!%p4543_p5), %v4641_v1 }
  0x18   : > { %s624_s23 = scalar_lea.vmem %s6066_s8, %s5141_s30  ;;  %s640_s21 = scalar_lea.vmem %s6070_s12, %s5141_s30 }
  0x19   : > { %s5159_s15 = scalar_lea.vmem %s6082_s3, %s4629_s20  ;;  %s5181_s3 = scalar_lea.vmem %s6067_s9, %s4629_s20  ;;  %656 = vst.msk [vmem:[#allocation2] sm:$0xff] (!%p4543_p5), %vm655_vm0, %v4635_v2  ;;  %657 = vst.msk [vmem:[#allocation2 + $0x8] sm:$0xff] (!%p4543_p5), %vm655_vm0, %v4636_v3 }
  0x1a   : > { %s5164_s26 = scalar_lea.vmem %s6083_s5, %s4629_s20  ;;  %s632_s5 = scalar_lea.vmem %s6068_s10, %s5141_s30  ;;  %658 = vst.msk [vmem:[#allocation2 + $0x10] sm:$0xff] (!%p4543_p5), %vm655_vm0, %v4639_v4  ;;  %659 = vst.msk [vmem:[#allocation2 + $0x18] sm:$0xff] (!%p4543_p5), %vm655_vm0, %v4640_v5 }
  0x1b   : > { %6084 = sst [smem:[#allocation9_spill]] %s5164_s26  ;;  %s4632_s26 = sshll.u32 %s5141_s30, 6 }
  0x1c   : > { %s5191_s17 = scalar_lea.vmem %s6069_s11, %s4632_s26 }
  0x1d PF: > { %vm664_vm1 = vcmask 261120   ;;  %v4881_v34 = vld [vmem:[%s5159_s15] sm:$0xff]   ;;  %v4882_v35 = vld [vmem:[%s5159_s15 + $0x8] sm:$0xff]   ;;  %s6085_s28 = scalar_lea.vmem %s6059_s1, %s5141_s30  ;;  %s6086_s16 = scalar_lea.vmem %s6060_s2, %s5141_s30  ;;  %vm5042_vm2 = vmmov 0   ;;  %vm2442_vm3 = vcmask 64512   ;;  %vm2840_vm5 = vcmask 130048  }
  0x1e   : > { %4696 = vmatprep.subr.bf16.mxu0 %v4881_v34  ;;  %v4544_v50 = vld [vmem:[%s6085_s28] ss:$0 sm:$0xff]  ;;  %s6087_s22 = scalar_lea.vmem %s6062_s4, %s5141_s30  ;;  %s5033_s20 = smov 112   ;;  %vm3935_vm6 = vcmask 195584  }
  0x1f   : > { %4697 = vmatpush3.bf16.msra.mxu0 %v4881_v34  ;;  %v4545_v56 = vld [vmem:[%s6086_s16] ss:$0 sm:$0xff]  ;;  %s5034_s24 = smov 120   ;;  %s5035_s14 = smov 104  }
  0x20   : > { %v660_v6 = vld [vmem:[#allocation2] sm:$0xff]  ;;  %v661_v8 = vld [vmem:[#allocation2 + $0x8] sm:$0xff]  ;;  %4698 = vmatprep.subr.bf16.mxu0 %v4882_v35  ;;  %s5036_s26 = smov 96   ;;  %s5040_s15 = smov 64  }
  0x21   : > { %v662_v7 = vld [vmem:[#allocation2 + $0x10] sm:$0xff]  ;;  %v665_v9 = vsel %vm664_vm1, %v660_v6, 0.0  ;;  %v663_v11 = vld [vmem:[#allocation2 + $0x18] sm:$0xff]  ;;  %v668_v12 = vsel %vm664_vm1, %v661_v8, 0.0  ;;  %v4546_v5 = vld [vmem:[%s6087_s22] ss:$0 sm:$0xff]  ;;  %s6089_s22 = scalar_lea.vmem %s6064_s6, %s5141_s30 }
  0x22   : > { %v671_v10 = vsel %vm664_vm1, %v662_v7, 0.0  ;;  %666 = vadd.xlane.f32.xlu0 %v665_v9  ;;  %v674_v13 = vsel %vm664_vm1, %v663_v11, 0.0  ;;  %s5043_s28 = smov 16   ;;  %s5044_s29 = smov 8  }
  0x23   : > { %672 = vadd.xlane.f32.xlu1 %v671_v10  ;;  %4699 = vmatpush3.bf16.msra.mxu0 %v4882_v35  ;;  %s5045_s13 = smov 24   ;;  %s6088_s16 = sld [smem:[#allocation9_spill]] }
  0x24   : > { %p4624_p6 = scmp.ne.s32.totalorder %s5023_s25, 1 }
  0x26   : > { %669 = vadd.xlane.f32.xlu0 %v668_v12 }
  0x27   : > { %675 = vadd.xlane.f32.xlu1 %v674_v13 }
  0xaf   : > { %v667_v14 = vpop.xlane.xlu0 %666 }
  0xb0   : > { %v673_v15 = vpop.xlane.xlu1 %672  ;;  %v678_v16 = vmul.f32 0.03125, %v667_v14 }
  0xb1   : > { %v680_v17 = vmul.f32 0.03125, %v673_v15  ;;  %v5037_v15 = vmov 1983009808  }
  0xb2   : > { %v682_v18 = vsub.f32 %v660_v6, %v678_v16  ;;  %v876_v16 = vunpack.c.l.s4 %v5037_v15 }
  0xb3   : > { %v684_v19 = vsub.f32 %v662_v7, %v680_v17  ;;  %v670_v20 = vpop.xlane.xlu0 %669  ;;  %v878_v17 = vlaneseq }
  0xb4   : > { %v676_v21 = vpop.xlane.xlu1 %675  ;;  %v679_v22 = vmul.f32 0.03125, %v670_v20  ;;  %v686_v24 = vmul.f32 %v682_v18, %v682_v18  ;;  %v5038_v20 = vmov 1934713408  }
  0xb5   : > { %v681_v23 = vmul.f32 0.03125, %v676_v21  ;;  %v688_v25 = vmul.f32 %v684_v19, %v684_v19  ;;  %v907_v21 = vunpack.c.l.s4 %v5038_v20 }
  0xb6   : > { %v683_v26 = vsub.f32 %v661_v8, %v679_v22  ;;  %v690_v28 = vsel %vm664_vm1, %v686_v24, 0.0 }
  0xb7   : > { %v685_v27 = vsub.f32 %v663_v11, %v681_v23  ;;  %691 = vadd.xlane.f32.xlu0 %v690_v28  ;;  %v696_v29 = vsel %vm664_vm1, %v688_v25, 0.0  ;;  %v5039_v23 = vmov 0  }
  0xb8   : > { %v687_v30 = vmul.f32 %v683_v26, %v683_v26  ;;  %v5246_v24 = vpack.i.b16 %v5039_v23, %v5039_v23 }
  0xb9   : > { %v689_v31 = vmul.f32 %v685_v27, %v685_v27 }
  0xba   : > { %v693_v32 = vsel %vm664_vm1, %v687_v30, 0.0 }
  0xbb   : > { %697 = vadd.xlane.f32.xlu0 %v696_v29  ;;  %694 = vadd.xlane.f32.xlu1 %v693_v32  ;;  %v699_v33 = vsel %vm664_vm1, %v689_v31, 0.0  ;;  %v908_v31 = vunpack.c.0.s8 %v907_v21 }
  0xbf   : > { %700 = vadd.xlane.f32.xlu1 %v699_v33 }
 0x144   : > { %v692_v36 = vpop.xlane.xlu0 %691 }
 0x145   : > { %v702_v37 = vmul.f32 0.03125, %v692_v36 }
 0x147   : > { %v706_v38 = vadd.f32 1e-05, %v702_v37 }
 0x148   : > { %v695_v39 = vpop.xlane.xlu1 %694  ;;  %v698_v40 = vpop.xlane.xlu0 %697 }
 0x149   : > { %4895 = vrsqrt.f32 %v706_v38  ;;  %v703_v41 = vmul.f32 0.03125, %v695_v39  ;;  %v704_v42 = vmul.f32 0.03125, %v698_v40 }
 0x14b   : > { %v707_v43 = vadd.f32 1e-05, %v703_v41  ;;  %v708_v44 = vadd.f32 1e-05, %v704_v42 }
 0x14c   : > { %v701_v45 = vpop.xlane.xlu1 %700 }
 0x14d   : > { %4897 = vrsqrt.f32 %v707_v43  ;;  %v705_v46 = vmul.f32 0.03125, %v701_v45 }
 0x14e   : > { %4899 = vrsqrt.f32 %v708_v44 }
 0x14f   : > { %v709_v47 = vadd.f32 1e-05, %v705_v46 }
 0x151   : > { %4901 = vrsqrt.f32 %v709_v47 }
 0x153   : > { %v4896_v48 = vpop.eup %4895 }
 0x154   : > { %v714_v49 = vmul.f32 %v4896_v48, %v682_v18  ;;  %v877_v18 = vunpack.c.0.s8 %v876_v16 }
 0x156   : > { %v725_v54 = vmul.f32 %v4544_v50, %v714_v49 }
 0x157   : > { %v4898_v51 = vpop.eup %4897 }
 0x158   : > { %v4900_v52 = vpop.eup %4899  ;;  %v715_v53 = vmul.f32 %v4898_v51, %v683_v26  ;;  %v736_v60 = vadd.f32 %v4545_v56, %v725_v54 }
 0x159   : > { %v716_v55 = vmul.f32 %v4900_v52, %v684_v19  ;;  %v879_v19 = vshrl.u32 %v878_v17, 7 }
 0x15a   : > { %v726_v57 = vmul.f32 %v4544_v50, %v715_v53 }
 0x15b   : > { %v4902_v58 = vpop.eup %4901  ;;  %v727_v62 = vmul.f32 %v4544_v50, %v716_v55  ;;  %v5258_v29 = vsub.s32 %v877_v18, %v879_v19  ;;  %v5273_v39 = vsub.s32 %v908_v31, %v879_v19 }
 0x15c   : > { %v717_v59 = vmul.f32 %v4902_v58, %v685_v27  ;;  %v737_v61 = vadd.f32 %v4545_v56, %v726_v57 }
 0x15d   : > { %v738_v1 = vadd.f32 %v4545_v56, %v727_v62 }
 0x15e   : > { %v740_v63 = vpack.c.bf16 %v737_v61, %v736_v60  ;;  %v728_v0 = vmul.f32 %v4544_v50, %v717_v59 }
 0x160   : > { %4700 = vmatprep.mubr.msk.bf16.mxu0 %vm664_vm1, %v740_v63  ;;  %v739_v2 = vadd.f32 %v4545_v56, %v728_v0 }
 0x162   : > { %v741_v3 = vpack.c.bf16 %v739_v2, %v738_v1 }
 0x164   : > { %4701 = vmatmul.mubr.msk.bf16.vlgmr.msra.gmra.mrb[0].mxu0 %vm664_vm1, %v741_v3 }
 0x237   : > { %v4702_v4 = vpop.f32.mrb[0].mxu0 }
 0x238   : > { %v805_v6 = vpop.f32.mrb[1].mxu0  ;;  %v814_v8 = vadd.f32 %v4702_v4, %v4546_v5 }
 0x239   : > { %v4703_v7 = vpop.f32.mrb[2].mxu0  ;;  %v806_v11 = vadd.f32 %v4546_v5, %v805_v6 }
 0x23a   : > { %v817_v9 = vadd.f32 %v4703_v7, %v4546_v5  ;;  %v808_v10 = vpop.f32.mrb[3].mxu0 }
 0x23b   : > { %v809_v12 = vadd.f32 %v4546_v5, %v808_v10 }
 0x23c   : > { %v5231_v13 = vpack.c.bf16 %v817_v9, %v814_v8 }
 0x23d   : > { %v5233_v14 = vpack.c.bf16 %v809_v12, %v806_v11 }
 0x23e   : > { %v862_v46 = vshrl.u32 %v5231_v13, 16 }
 0x23f   : > { %828 = vrot.lane.b32.xlu1 %v5233_v14, %s5033_s20  ;;  %824 = vrot.lane.b32.xlu0 %v5233_v14, %s5034_s24  ;;  %v840_v27 = vshrl.u32 %v5233_v14, 16 }
 0x243   : > { %832 = vrot.lane.b32.xlu1 %v5233_v14, %s5035_s14  ;;  %830 = vrot.lane.b32.xlu0 %v5231_v13, %s5033_s20 }
 0x247   : > { %826 = vrot.lane.b32.xlu1 %v5231_v13, %s5034_s24  ;;  %1362 = vrot.lane.b32.xlu0 %v5233_v14, %s5036_s26 }
 0x24b   : > { %834 = vrot.lane.b32.xlu1 %v5231_v13, %s5035_s14 }
 0x2b1   : > { %v5244_v22 = vpop.permute.xlu1 %828  ;;  %v5248_v25 = vpop.permute.xlu0 %824 }
 0x2b2   : > { %v838_v26 = vpack.i.b16 %v5248_v25, %v5233_v14  ;;  %v841_v28 = vshrl.u32 %v5248_v25, 16  ;;  %1370 = vrot.lane.b32.xlu0 %v5244_v22, %s5036_s26  ;;  %1366 = vrot.lane.b32.xlu1 %v5248_v25, %s5036_s26  ;;  %v848_v36 = vshrl.u32 %v5244_v22, 16 }
 0x2b4   : > { %v842_v30 = vpack.i.b16 %v841_v28, %v840_v27  ;;  %v874_v32 = vcombine.high %v838_v26, %v5246_v24  ;;  %v881_v38 = vrot.slane %v838_v26, %v5258_v29 }
 0x2b5   : > { %v5261_v33 = vpop.permute.xlu1 %832  ;;  %v5279_v45 = vpop.permute.xlu0 %830 }
 0x2b6   : > { %v940_v34 = vcombine.high %v842_v30, %v5246_v24  ;;  %v846_v35 = vpack.i.b16 %v5261_v33, %v5244_v22  ;;  %1364 = vrot.lane.b32.xlu0 %v5231_v13, %s5036_s26  ;;  %v849_v37 = vshrl.u32 %v5261_v33, 16  ;;  %1374 = vrot.lane.b32.xlu1 %v5261_v33, %s5036_s26  ;;  %v888_v42 = vrot.slane %v874_v32, %v5258_v29 }
 0x2b7   : > { %v947_v43 = vrot.slane %v842_v30, %v5258_v29  ;;  %v870_v31 = vshrl.u32 %v5279_v45, 16 }
 0x2b8   : > { %v889_v40 = vcombine.high %v846_v35, %v5246_v24  ;;  %v896_v41 = vrot.slane %v846_v35, %v5258_v29  ;;  %v850_v44 = vpack.i.b16 %v849_v37, %v848_v36  ;;  %v954_v48 = vrot.slane %v940_v34, %v5258_v29 }
 0x2b9   : > { %v827_v47 = vpop.permute.xlu1 %826 }
 0x2ba   : > { %v903_v49 = vrot.slane %v889_v40, %v5258_v29  ;;  %v904_v50 = vcombine.low %v881_v38, %v896_v41  ;;  %v905_v51 = vcombine.high %v881_v38, %v896_v41  ;;  %1372 = vrot.lane.b32.xlu0 %v5279_v45, %s5036_s26  ;;  %v955_v52 = vcombine.high %v850_v44, %v5246_v24 }
 0x2bb   : > { %v962_v53 = vrot.slane %v850_v44, %v5258_v29  ;;  %v860_v54 = vpack.i.b16 %v827_v47, %v5231_v13  ;;  %v863_v55 = vshrl.u32 %v827_v47, 16  ;;  %1368 = vrot.lane.b32.xlu1 %v827_v47, %s5036_s26 }
 0x2bc   : > { %v912_v56 = vrot.slane %v904_v50, %v5273_v39  ;;  %v919_v57 = vrot.slane %v905_v51, %v5273_v39  ;;  %v920_v58 = vcombine.low %v888_v42, %v903_v49  ;;  %v921_v59 = vcombine.high %v888_v42, %v903_v49 }
 0x2bd   : > { %v969_v60 = vrot.slane %v955_v52, %v5258_v29  ;;  %v970_v61 = vcombine.low %v947_v43, %v962_v53  ;;  %v971_v62 = vcombine.high %v947_v43, %v962_v53  ;;  %v864_v63 = vpack.i.b16 %v863_v55, %v862_v46  ;;  %v5293_v0 = vpop.permute.xlu1 %834 }
 0x2be   : > { %v928_v1 = vrot.slane %v920_v58, %v5273_v39  ;;  %v935_v2 = vrot.slane %v921_v59, %v5273_v39  ;;  %v1138_v3 = vcombine.low %v912_v56, %v919_v57  ;;  %v4551_v4 = vcombine.high %v912_v56, %v919_v57  ;;  %1898 = vrot.lane.b32.xlu0 %v5233_v14, %s5040_s15 }
 0x2bf   : > { %v978_v5 = vrot.slane %v970_v61, %v5273_v39  ;;  %v985_v6 = vrot.slane %v971_v62, %v5273_v39  ;;  %v986_v7 = vcombine.low %v954_v48, %v969_v60  ;;  %v987_v8 = vcombine.high %v954_v48, %v969_v60  ;;  %1376 = vrot.lane.b32.xlu1 %v5293_v0, %s5036_s26 }
 0x2c0   : > { %v1145_v9 = vrot.slane %v1138_v3, %v5258_v29  ;;  %v1153_v10 = vrot.slane %v4551_v4, %v5258_v29  ;;  %v1154_v11 = vcombine.low %v928_v1, %v935_v2  ;;  %v4552_v12 = vcombine.high %v928_v1, %v935_v2 }
 0x2c1   : > { %v994_v15 = vrot.slane %v986_v7, %v5273_v39  ;;  %v1001_v16 = vrot.slane %v987_v8, %v5273_v39  ;;  %v1188_v14 = vcombine.low %v978_v5, %v985_v6  ;;  %v4553_v18 = vcombine.high %v978_v5, %v985_v6 }
 0x2c2   : > { %v1161_v19 = vrot.slane %v1154_v11, %v5258_v29  ;;  %v1169_v20 = vrot.slane %v4552_v12, %v5258_v29  ;;  %v1170_v21 = vcombine.low %v1145_v9, %v1153_v10  ;;  %v1006_v23 = vcombine.high %v860_v54, %v5246_v24  ;;  %1900 = vrot.lane.b32.xlu0 %v5231_v13, %s5040_s15 }
 0x2c3   : > { %v5313_v26 = vrot.slane %v1188_v14, %v5258_v29  ;;  %v1203_v27 = vrot.slane %v4553_v18, %v5258_v29  ;;  %v1204_v28 = vcombine.low %v994_v15, %v1001_v16  ;;  %v4554_v30 = vcombine.high %v994_v15, %v1001_v16  ;;  %1904 = vrot.lane.b32.xlu1 %v827_v47, %s5040_s15 }
 0x2c4   : > { %v1072_v32 = vcombine.high %v864_v63, %v5246_v24  ;;  %v868_v13 = vpack.i.b16 %v5293_v0, %v5279_v45  ;;  %v871_v36 = vshrl.u32 %v5293_v0, 16  ;;  %v1013_v37 = vrot.slane %v860_v54, %v5258_v29 }
 0x2c5   : > { %v1211_v34 = vrot.slane %v1204_v28, %v5258_v29  ;;  %v1219_v35 = vrot.slane %v4554_v30, %v5258_v29  ;;  %v1020_v38 = vrot.slane %v1006_v23, %v5258_v29  ;;  %v1178_v40 = vcombine.low %v1161_v19, %v1169_v20 }
 0x2c6   : > { %v1220_v41 = vcombine.low %v5313_v26, %v1203_v27  ;;  %v872_v42 = vpack.i.b16 %v871_v36, %v870_v31  ;;  %v1021_v43 = vcombine.high %v868_v13, %v5246_v24  ;;  %v1028_v44 = vrot.slane %v868_v13, %v5258_v29 }
 0x2c7   : > { %1908 = vrot.lane.b32.xlu1 %v5279_v45, %s5040_s15  ;;  %v1228_v46 = vcombine.low %v1211_v34, %v1219_v35  ;;  %v1079_v47 = vrot.slane %v864_v63, %v5258_v29  ;;  %v1086_v48 = vrot.slane %v1072_v32, %v5258_v29  ;;  %v1177_v49 = vrot.slane %v1170_v21, %v5273_v39 }
 0x2c8   : > { %v1185_v50 = vrot.slane %v1178_v40, %v5273_v39  ;;  %v1035_v51 = vrot.slane %v1021_v43, %v5258_v29  ;;  %v1036_v52 = vcombine.low %v1013_v37, %v1028_v44  ;;  %v1037_v53 = vcombine.high %v1013_v37, %v1028_v44 }
 0x2c9   : > { %v1087_v54 = vcombine.high %v872_v42, %v5246_v24  ;;  %v1094_v55 = vrot.slane %v872_v42, %v5258_v29  ;;  %v1235_v45 = vrot.slane %v1228_v46, %v5273_v39  ;;  %v5041_v1 = vmov 0.0  }
 0x2ca   : > { %v5338_v56 = vcombine.low %v1177_v49, %v1185_v50  ;;  %v1044_v57 = vrot.slane %v1036_v52, %v5273_v39  ;;  %v1051_v58 = vrot.slane %v1037_v53, %v5273_v39  ;;  %v1052_v59 = vcombine.low %v1020_v38, %v1035_v51  ;;  %4704 = vmatprep.subr.bf16.mxu0 %v5041_v1 }
 0x2cb   : > { %v1053_v60 = vcombine.high %v1020_v38, %v1035_v51  ;;  %1902 = vrot.lane.b32.xlu1 %v5248_v25, %s5040_s15  ;;  %v1101_v61 = vrot.slane %v1087_v54, %v5258_v29  ;;  %v1102_v62 = vcombine.low %v1079_v47, %v1094_v55  ;;  %v1103_v63 = vcombine.high %v1079_v47, %v1094_v55 }
 0x2cc   : > { %4716 = vmatprep.subr.bf16.mxu1 %v5041_v1  ;;  %v1060_v2 = vrot.slane %v1052_v59, %v5273_v39  ;;  %v1238_v4 = vcombine.low %v1044_v57, %v1051_v58  ;;  %v4555_v5 = vcombine.high %v1044_v57, %v1051_v58  ;;  %v1227_v23 = vrot.slane %v1220_v41, %v5273_v39 }
 0x2cd   : > { %v1067_v3 = vrot.slane %v1053_v60, %v5273_v39  ;;  %v1110_v6 = vrot.slane %v1102_v62, %v5273_v39  ;;  %v1117_v7 = vrot.slane %v1103_v63, %v5273_v39  ;;  %v1118_v25 = vcombine.low %v1086_v48, %v1101_v61  ;;  %4706 = vmatprep.mubr.msk.bf16.mxu0 %vm5042_vm2, %v5041_v1  ;;  %v1363_v63 = vpop.permute.xlu0 %1362 }
 0x2ce   : > { %v1119_v8 = vcombine.high %v1086_v48, %v1101_v61  ;;  %v1245_v9 = vrot.slane %v1238_v4, %v5258_v29  ;;  %v1253_v10 = vrot.slane %v4555_v5, %v5258_v29  ;;  %v5367_v31 = vcombine.high %v1177_v49, %v1185_v50  ;;  %4718 = vmatprep.mubr.msk.bf16.mxu1 %vm5042_vm2, %v5041_v1 }
 0x2cf   : > { %v1254_v11 = vcombine.low %v1060_v2, %v1067_v3  ;;  %v4556_v12 = vcombine.high %v1060_v2, %v1067_v3  ;;  %1906 = vrot.lane.b32.xlu1 %v5244_v22, %s5040_s15  ;;  %v1126_v15 = vrot.slane %v1118_v25, %v5273_v39  ;;  %v1288_v14 = vcombine.low %v1110_v6, %v1117_v7 }
 0x2d0   : > { %v1133_v16 = vrot.slane %v1119_v8, %v5273_v39  ;;  %v4557_v18 = vcombine.high %v1110_v6, %v1117_v7  ;;  %v1270_v21 = vcombine.low %v1245_v9, %v1253_v10  ;;  %v5365_v22 = vcombine.low %v1227_v23, %v1235_v45 }
 0x2d1   : > { %v1261_v19 = vrot.slane %v1254_v11, %v5258_v29  ;;  %v1269_v20 = vrot.slane %v4556_v12, %v5258_v29  ;;  %v1295_v26 = vrot.slane %v1288_v14, %v5258_v29  ;;  %v5369_v32 = vcombine.high %v1227_v23, %v1235_v45 }
 0x2d2   : > { %v1303_v27 = vrot.slane %v4557_v18, %v5258_v29  ;;  %v1304_v28 = vcombine.low %v1126_v15, %v1133_v16  ;;  %v4558_v30 = vcombine.high %v1126_v15, %v1133_v16  ;;  %v1341_v34 = vshrl.u32 %v5338_v56, 16 }
 0x2d3   : > { %1910 = vrot.lane.b32.xlu1 %v5261_v33, %s5040_s15  ;;  %v1278_v36 = vcombine.low %v1261_v19, %v1269_v20  ;;  %v1340_v38 = vpack.i.b16 %v5365_v22, %v5338_v56  ;;  %v1346_v33 = vpack.i.b16 %v5369_v32, %v5367_v31  ;;  %v1347_v40 = vshrl.u32 %v5367_v31, 16 }
 0x2d4   : > { %v1311_v35 = vrot.slane %v1304_v28, %v5258_v29  ;;  %v1319_v13 = vrot.slane %v4558_v30, %v5258_v29  ;;  %v1320_v37 = vcombine.low %v1295_v26, %v1303_v27  ;;  %v1348_v41 = vshrl.u32 %v5369_v32, 16 }
 0x2d5   : > { %v1342_v42 = vshrl.u32 %v5365_v22, 16  ;;  %v1277_v43 = vrot.slane %v1270_v21, %v5273_v39  ;;  %v1285_v44 = vrot.slane %v1278_v36, %v5273_v39  ;;  %v1382_v9 = vshrl.u32 %v1363_v63, 16 }
 0x2d6   : > { %v1328_v46 = vcombine.low %v1311_v35, %v1319_v13  ;;  %v1327_v47 = vrot.slane %v1320_v37, %v5273_v39  ;;  %v5384_v48 = vpack.i.b16 %v1348_v41, %v1347_v40 }
 0x2d7   : > { %v5390_v49 = vpack.i.b16 %v1342_v42, %v1341_v34  ;;  %v5392_v50 = vcombine.low %v1277_v43, %v1285_v44  ;;  %v5395_v52 = vcombine.high %v1277_v43, %v1285_v44 }
 0x2d8   : > { %v1335_v51 = vrot.slane %v1328_v46, %v5273_v39 }
 0x2d9   : > { %v1353_v55 = vshrl.u32 %v5392_v50, 16  ;;  %v1359_v45 = vshrl.u32 %v5395_v52, 16 }
 0x2da   : > { %v5397_v53 = vcombine.low %v1327_v47, %v1335_v51  ;;  %v5399_v54 = vcombine.high %v1327_v47, %v1335_v51 }
 0x2dc   : > { %v1352_v57 = vpack.i.b16 %v5397_v53, %v5392_v50  ;;  %v1358_v58 = vpack.i.b16 %v5399_v54, %v5395_v52  ;;  %v1354_v59 = vshrl.u32 %v5397_v53, 16  ;;  %v1360_v60 = vshrl.u32 %v5399_v54, 16 }
 0x2dd   : > { %v5643_v52 = vand.u32 127, %v878_v17 }
 0x2de   : > { %v5409_v61 = vpack.i.b16 %v1354_v59, %v1353_v55  ;;  %v5411_v62 = vpack.i.b16 %v1360_v60, %v1359_v45 }
 0x2df   : > { %vm2821_vm4 = vcmp.lt.s32.totalorder %v5643_v52, 12 }
 0x324   : > { %v1367_v2 = vpop.permute.xlu1 %1366  ;;  %v1371_v3 = vpop.permute.xlu0 %1370 }
 0x325   : > { %v1380_v4 = vpack.i.b16 %v1367_v2, %v1363_v63  ;;  %v1383_v5 = vshrl.u32 %v1367_v2, 16  ;;  %v1390_v7 = vshrl.u32 %v1371_v3, 16 }
 0x327   : > { %v1410_v10 = vcombine.high %v1380_v4, %v5246_v24  ;;  %v1384_v14 = vpack.i.b16 %v1383_v5, %v1382_v9  ;;  %v1417_v18 = vrot.slane %v1380_v4, %v5258_v29 }
 0x328   : > { %v1375_v6 = vpop.permute.xlu1 %1374  ;;  %v1365_v16 = vpop.permute.xlu0 %1364 }
 0x329   : > { %v1388_v25 = vpack.i.b16 %v1375_v6, %v1371_v3  ;;  %v1391_v8 = vshrl.u32 %v1375_v6, 16  ;;  %v1424_v26 = vrot.slane %v1410_v10, %v5258_v29  ;;  %v1476_v30 = vcombine.high %v1384_v14, %v5246_v24 }
 0x32a   : > { %v1483_v34 = vrot.slane %v1384_v14, %v5258_v29  ;;  %v1398_v51 = vshrl.u32 %v1365_v16, 16 }
 0x32b   : > { %v1392_v11 = vpack.i.b16 %v1391_v8, %v1390_v7  ;;  %v1425_v12 = vcombine.high %v1388_v25, %v5246_v24  ;;  %v1432_v15 = vrot.slane %v1388_v25, %v5258_v29  ;;  %v1490_v55 = vrot.slane %v1476_v30, %v5258_v29 }
 0x32c   : > { %v1373_v41 = vpop.permute.xlu0 %1372 }
 0x32d   : > { %v1369_v19 = vpop.permute.xlu1 %1368  ;;  %v1439_v20 = vrot.slane %v1425_v12, %v5258_v29  ;;  %v1440_v21 = vcombine.low %v1417_v18, %v1432_v15  ;;  %v1441_v23 = vcombine.high %v1417_v18, %v1432_v15  ;;  %v1491_v27 = vcombine.high %v1392_v11, %v5246_v24 }
 0x32e   : > { %v1498_v28 = vrot.slane %v1392_v11, %v5258_v29  ;;  %v1396_v37 = vpack.i.b16 %v1369_v19, %v1365_v16  ;;  %v1399_v40 = vshrl.u32 %v1369_v19, 16  ;;  %v1406_v45 = vshrl.u32 %v1373_v41, 16 }
 0x32f   : > { %v1456_v13 = vcombine.low %v1424_v26, %v1439_v20  ;;  %v1457_v36 = vcombine.high %v1424_v26, %v1439_v20  ;;  %v1448_v42 = vrot.slane %v1440_v21, %v5273_v39  ;;  %v1455_v43 = vrot.slane %v1441_v23, %v5273_v39 }
 0x330   : > { %v1505_v44 = vrot.slane %v1491_v27, %v5258_v29  ;;  %v1506_v46 = vcombine.low %v1483_v34, %v1498_v28  ;;  %v1507_v47 = vcombine.high %v1483_v34, %v1498_v28  ;;  %v1400_v2 = vpack.i.b16 %v1399_v40, %v1398_v51 }
 0x331   : > { %v1377_v35 = vpop.permute.xlu1 %1376  ;;  %v1464_v60 = vrot.slane %v1456_v13, %v5273_v39  ;;  %v1471_v63 = vrot.slane %v1457_v36, %v5273_v39  ;;  %v1542_v3 = vcombine.high %v1396_v37, %v5246_v24  ;;  %v1674_v4 = vcombine.low %v1448_v42, %v1455_v43 }
 0x332   : > { %v4559_v5 = vcombine.high %v1448_v42, %v1455_v43  ;;  %v1404_v6 = vpack.i.b16 %v1377_v35, %v1373_v41  ;;  %v1407_v7 = vshrl.u32 %v1377_v35, 16  ;;  %v5433_v25 = vrot.slane %v1506_v46, %v5273_v39 }
 0x333   : > { %v5436_v8 = vrot.slane %v1507_v47, %v5273_v39  ;;  %v1522_v9 = vcombine.low %v1490_v55, %v1505_v44  ;;  %v1523_v10 = vcombine.high %v1490_v55, %v1505_v44  ;;  %v1549_v11 = vrot.slane %v1396_v37, %v5258_v29 }
 0x334   : > { %v1408_v12 = vpack.i.b16 %v1407_v7, %v1406_v45  ;;  %v1557_v15 = vcombine.high %v1404_v6, %v5246_v24  ;;  %v1564_v16 = vrot.slane %v1404_v6, %v5258_v29  ;;  %v1690_v18 = vcombine.low %v1464_v60, %v1471_v63 }
 0x335   : > { %v5427_v59 = vpop.permute.xlu1 %1904  ;;  %v4560_v19 = vcombine.high %v1464_v60, %v1471_v63  ;;  %v1556_v20 = vrot.slane %v1542_v3, %v5258_v29  ;;  %v1608_v21 = vcombine.high %v1400_v2, %v5246_v24  ;;  %v1530_v30 = vrot.slane %v1522_v9, %v5273_v39  ;;  %v1899_v63 = vpop.permute.xlu0 %1898 }
 0x336   : > { %v1571_v23 = vrot.slane %v1557_v15, %v5258_v29  ;;  %v1572_v26 = vcombine.low %v1549_v11, %v1564_v16  ;;  %v1573_v27 = vcombine.high %v1549_v11, %v1564_v16  ;;  %v1623_v28 = vcombine.high %v1408_v12, %v5246_v24 }
 0x337   : > { %v1537_v34 = vrot.slane %v1523_v10, %v5273_v39  ;;  %v1615_v35 = vrot.slane %v1400_v2, %v5258_v29  ;;  %v1630_v13 = vrot.slane %v1408_v12, %v5258_v29  ;;  %v1622_v43 = vrot.slane %v1608_v21, %v5258_v29 }
 0x338   : > { %v1580_v36 = vrot.slane %v1572_v26, %v5273_v39  ;;  %v1587_v37 = vrot.slane %v1573_v27, %v5273_v39  ;;  %v1588_v40 = vcombine.low %v1556_v20, %v1571_v23  ;;  %v1589_v41 = vcombine.high %v1556_v20, %v1571_v23 }
 0x339   : > { %v5441_v14 = vpop.permute.xlu1 %1908  ;;  %v1637_v44 = vrot.slane %v1623_v28, %v5258_v29  ;;  %v1638_v46 = vcombine.low %v1615_v35, %v1630_v13  ;;  %v1639_v47 = vcombine.high %v1615_v35, %v1630_v13  ;;  %v1681_v51 = vrot.slane %v1674_v4, %v5258_v29 }
 0x33a   : > { %v1689_v55 = vrot.slane %v4559_v5, %v5258_v29  ;;  %v5458_v45 = vrot.slane %v1588_v40, %v5273_v39  ;;  %v5461_v60 = vrot.slane %v1589_v41, %v5273_v39  ;;  %v1774_v6 = vcombine.low %v1580_v36, %v1587_v37 }
 0x33b   : > { %v1654_v2 = vcombine.low %v1622_v43, %v1637_v44  ;;  %v1655_v3 = vcombine.high %v1622_v43, %v1637_v44  ;;  %v4563_v7 = vcombine.high %v1580_v36, %v1587_v37  ;;  %v1724_v9 = vcombine.low %v5433_v25, %v5436_v8 }
 0x33c   : > { %v4561_v10 = vcombine.high %v5433_v25, %v5436_v8  ;;  %v5468_v4 = vrot.slane %v1638_v46, %v5273_v39  ;;  %v5471_v5 = vrot.slane %v1639_v47, %v5273_v39  ;;  %v1740_v12 = vcombine.low %v1530_v30, %v1537_v34 }
 0x33d   : > { %v1903_v42 = vpop.permute.xlu1 %1902  ;;  %v1918_v15 = vshrl.u32 %v1899_v63, 16  ;;  %v1697_v16 = vrot.slane %v1690_v18, %v5258_v29  ;;  %v1705_v20 = vrot.slane %v4560_v19, %v5258_v29  ;;  %v5476_v21 = vrot.slane %v1654_v2, %v5273_v39 }
 0x33e   : > { %v5479_v23 = vrot.slane %v1655_v3, %v5273_v39  ;;  %v1916_v25 = vpack.i.b16 %v1903_v42, %v1899_v63  ;;  %v1919_v8 = vshrl.u32 %v1903_v42, 16  ;;  %v4562_v26 = vcombine.high %v1530_v30, %v1537_v34 }
 0x33f   : > { %v5482_v27 = vrot.slane %v1774_v6, %v5258_v29  ;;  %v5485_v28 = vrot.slane %v4563_v7, %v5258_v29  ;;  %v1790_v18 = vcombine.low %v5458_v45, %v5461_v60  ;;  %v4564_v19 = vcombine.high %v5458_v45, %v5461_v60 }
 0x340   : > { %v1824_v35 = vcombine.low %v5468_v4, %v5471_v5  ;;  %v1920_v13 = vpack.i.b16 %v1919_v8, %v1918_v15  ;;  %v1706_v36 = vcombine.low %v1681_v51, %v1689_v55  ;;  %v1946_v30 = vcombine.high %v1916_v25, %v5246_v24 }
 0x341   : > { %v1907_v11 = vpop.permute.xlu1 %1906  ;;  %v1714_v34 = vcombine.low %v1697_v16, %v1705_v20  ;;  %v1731_v40 = vrot.slane %v1724_v9, %v5258_v29  ;;  %v1739_v41 = vrot.slane %v4561_v10, %v5258_v29  ;;  %v4565_v42 = vcombine.high %v5468_v4, %v5471_v5 }
 0x342   : > { %v1840_v43 = vcombine.low %v5476_v21, %v5479_v23  ;;  %v2012_v44 = vcombine.high %v1920_v13, %v5246_v24  ;;  %v1747_v46 = vrot.slane %v1740_v12, %v5258_v29  ;;  %v1755_v51 = vrot.slane %v4562_v26, %v5258_v29 }
 0x343   : > { %v1721_v47 = vrot.slane %v1714_v34, %v5273_v39  ;;  %v1756_v55 = vcombine.low %v1731_v40, %v1739_v41  ;;  %v4566_v60 = vcombine.high %v5476_v21, %v5479_v23  ;;  %v1953_v63 = vrot.slane %v1916_v25, %v5258_v29 }
 0x344   : > { %v1926_v2 = vshrl.u32 %v1907_v11, 16  ;;  %v1960_v6 = vrot.slane %v1946_v30, %v5258_v29  ;;  %v2019_v7 = vrot.slane %v1920_v13, %v5258_v29  ;;  %v1713_v9 = vrot.slane %v1706_v36, %v5273_v39 }
 0x345   : > { %v1911_v37 = vpop.permute.xlu1 %1910  ;;  %v1764_v10 = vcombine.low %v1747_v46, %v1755_v51  ;;  %v2026_v12 = vrot.slane %v2012_v44, %v5258_v29  ;;  %v1763_v26 = vrot.slane %v1756_v55, %v5273_v39  ;;  %v5516_v25 = vrot.slane %v1790_v18, %v5258_v29 }
 0x346   : > { %v1924_v45 = vpack.i.b16 %v1911_v37, %v1907_v11  ;;  %v1927_v3 = vshrl.u32 %v1911_v37, 16  ;;  %v1722_v8 = vcombine.low %v1713_v9, %v1721_v47  ;;  %v5520_v40 = vcombine.high %v1713_v9, %v1721_v47 }
 0x347   : > { %v1771_v11 = vrot.slane %v1764_v10, %v5273_v39 }
 0x348   : > { %v1928_v15 = vpack.i.b16 %v1927_v3, %v1926_v2  ;;  %v1961_v16 = vcombine.high %v1924_v45, %v5246_v24  ;;  %v1968_v20 = vrot.slane %v1924_v45, %v5258_v29  ;;  %v1805_v3 = vrot.slane %v4564_v19, %v5258_v29 }
 0x349   : > { %v1772_v34 = vcombine.low %v1763_v26, %v1771_v11  ;;  %v5522_v41 = vcombine.high %v1763_v26, %v1771_v11  ;;  %v1883_v56 = vshrl.u32 %v5520_v40, 16 }
 0x34a   : > { %v1975_v13 = vrot.slane %v1961_v16, %v5258_v29  ;;  %v1976_v37 = vcombine.low %v1953_v63, %v1968_v20  ;;  %v1977_v36 = vcombine.high %v1953_v63, %v1968_v20  ;;  %v2027_v30 = vcombine.high %v1928_v15, %v5246_v24 }
 0x34b   : > { %v2034_v44 = vrot.slane %v1928_v15, %v5258_v29  ;;  %v1876_v45 = vpack.i.b16 %v1772_v34, %v1722_v8  ;;  %v1882_v2 = vpack.i.b16 %v5522_v41, %v5520_v40  ;;  %v1878_v19 = vshrl.u32 %v1772_v34, 16 }
 0x34c   : > { %v1984_v46 = vrot.slane %v1976_v37, %v5273_v39  ;;  %v1991_v51 = vrot.slane %v1977_v36, %v5273_v39  ;;  %v1992_v55 = vcombine.low %v1960_v6, %v1975_v13  ;;  %v1993_v18 = vcombine.high %v1960_v6, %v1975_v13 }
 0x34d   : > { %v2041_v63 = vrot.slane %v2027_v30, %v5258_v29  ;;  %v2042_v10 = vcombine.low %v2019_v7, %v2034_v44  ;;  %v2043_v15 = vcombine.high %v2019_v7, %v2034_v44  ;;  %v2447_v16 = vsel %vm2442_vm3, %v1876_v45, 0 }
 0x34e   : > { %v2000_v47 = vrot.slane %v1992_v55, %v5273_v39  ;;  %v2007_v9 = vrot.slane %v1993_v18, %v5273_v39  ;;  %v2541_v20 = vsel %vm2442_vm3, %v1882_v2, 0  ;;  %4705 = vmatpush3.bf16.xpose.msra.mxu0 %v2447_v16  ;;  %v2210_v37 = vcombine.low %v1984_v46, %v1991_v51 }
 0x34f   : > { %v2058_v26 = vcombine.low %v2026_v12, %v2041_v63  ;;  %v2059_v6 = vcombine.high %v2026_v12, %v2041_v63  ;;  %4717 = vmatpush3.bf16.xpose.msra.mxu1 %v2541_v20  ;;  %v2050_v11 = vrot.slane %v2042_v10, %v5273_v39  ;;  %v2057_v13 = vrot.slane %v2043_v15, %v5273_v39 }
 0x350   : > { %v4567_v55 = vcombine.high %v1984_v46, %v1991_v51  ;;  %v2226_v7 = vcombine.low %v2000_v47, %v2007_v9  ;;  %4710 = vmatprep.subr.bf16.mxu0 %v5041_v1  ;;  %v4568_v44 = vcombine.high %v2000_v47, %v2007_v9  ;;  %4728 = vmatprep.subr.bf16.mxu1 %v5041_v1  ;;  %v1877_v12 = vshrl.u32 %v1722_v8, 16 }
 0x351   : > { %v2066_v36 = vrot.slane %v2058_v26, %v5273_v39  ;;  %v2073_v30 = vrot.slane %v2059_v6, %v5273_v39  ;;  %v2260_v18 = vcombine.low %v2050_v11, %v2057_v13  ;;  %v4569_v45 = vcombine.high %v2050_v11, %v2057_v13 }
 0x352   : > { %v2217_v2 = vrot.slane %v2210_v37, %v5258_v29  ;;  %v2225_v63 = vrot.slane %v4567_v55, %v5258_v29  ;;  %v1806_v34 = vcombine.low %v5482_v27, %v5485_v28  ;;  %v1814_v10 = vcombine.low %v5516_v25, %v1805_v3 }
 0x353   : > { %v2233_v46 = vrot.slane %v2226_v7, %v5258_v29  ;;  %v2241_v51 = vrot.slane %v4568_v44, %v5258_v29  ;;  %v2276_v15 = vcombine.low %v2066_v36, %v2073_v30  ;;  %v1879_v47 = vpack.i.b16 %v1878_v19, %v1877_v12 }
 0x354   : > { %v4570_v9 = vcombine.high %v2066_v36, %v2073_v30  ;;  %v1831_v8 = vrot.slane %v1824_v35, %v5258_v29  ;;  %v1839_v16 = vrot.slane %v4565_v42, %v5258_v29  ;;  %v1847_v27 = vrot.slane %v1840_v43, %v5258_v29 }
 0x355   : > { %v2267_v28 = vrot.slane %v2260_v18, %v5258_v29  ;;  %v2275_v25 = vrot.slane %v4569_v45, %v5258_v29  ;;  %v1855_v3 = vrot.slane %v4566_v60, %v5258_v29  ;;  %v1884_v35 = vshrl.u32 %v5522_v41, 16  ;;  %4707 = vmatmul.mubr.msk.bf16.vlgmr.msra.gmra.mrb[4].mxu0 %vm2442_vm3, %v1340_v38 }
 0x356   : > { %4719 = vmatmul.mubr.msk.bf16.vlgmr.msra.gmra.mrb[0].mxu1 %vm2442_vm3, %v1346_v33  ;;  %v2494_v4 = vsel %vm2442_vm3, %v1879_v47, 0  ;;  %v1856_v5 = vcombine.low %v1831_v8, %v1839_v16  ;;  %v2242_v42 = vcombine.low %v2217_v2, %v2225_v63  ;;  %v1821_v21 = vrot.slane %v1814_v10, %v5273_v39  ;;  %4712 = vmatprep.mubr.msk.bf16.mxu0 %vm5042_vm2, %v5041_v1 }
 0x357   : > { %4711 = vmatpush3.bf16.xpose.msra.mxu0 %v2494_v4  ;;  %v1864_v23 = vcombine.low %v1847_v27, %v1855_v3  ;;  %v2250_v43 = vcombine.low %v2233_v46, %v2241_v51  ;;  %v1813_v22 = vrot.slane %v1806_v34, %v5273_v39  ;;  %4730 = vmatprep.mubr.msk.bf16.mxu1 %vm5042_vm2, %v5041_v1 }
 0x358   : > { %4722 = vmatprep.subr.bf16.mxu0 %v5041_v1  ;;  %v2283_v31 = vrot.slane %v2276_v15, %v5258_v29  ;;  %v2291_v32 = vrot.slane %v4570_v9, %v5258_v29  ;;  %v1863_v38 = vrot.slane %v1856_v5, %v5273_v39  ;;  %v2292_v41 = vcombine.low %v2267_v28, %v2275_v25 }
 0x359   : > { %v1871_v33 = vrot.slane %v1864_v23, %v5273_v39  ;;  %v2257_v60 = vrot.slane %v2250_v43, %v5273_v39  ;;  %v1885_v20 = vpack.i.b16 %v1884_v35, %v1883_v56  ;;  %v2249_v40 = vrot.slane %v2242_v42, %v5273_v39 }
 0x35a   : > { %v2300_v26 = vcombine.low %v2283_v31, %v2291_v32  ;;  %v1822_v6 = vcombine.low %v1813_v22, %v1821_v21  ;;  %v2299_v13 = vrot.slane %v2292_v41, %v5273_v39  ;;  %v1823_v63 = vcombine.high %v1813_v22, %v1821_v21 }
 0x35b   : > { %v1872_v11 = vcombine.low %v1863_v38, %v1871_v33  ;;  %v5592_v19 = vcombine.high %v2249_v40, %v2257_v60  ;;  %v2588_v30 = vsel %vm2442_vm3, %v1885_v20, 0  ;;  %v1873_v18 = vcombine.high %v1863_v38, %v1871_v33 }
 0x35c   : > { %v2307_v37 = vrot.slane %v2300_v26, %v5273_v39  ;;  %v1889_v45 = vshrl.u32 %v1822_v6, 16  ;;  %v1895_v8 = vshrl.u32 %v1823_v63, 16 }
 0x35d   : > { %v1888_v36 = vpack.i.b16 %v1872_v11, %v1822_v6  ;;  %v1890_v55 = vshrl.u32 %v1872_v11, 16  ;;  %v1894_v46 = vpack.i.b16 %v1873_v18, %v1823_v63  ;;  %v1896_v15 = vshrl.u32 %v1873_v18, 16 }
 0x35e   : > { %4713 = vmatmul.mubr.msk.bf16.vlgmr.msra.gmra.mrb[8].mxu0 %vm2442_vm3, %v5390_v49  ;;  %v5597_v7 = vcombine.high %v2299_v13, %v2307_v37  ;;  %v2422_v49 = vshrl.u32 %v5592_v19, 16  ;;  %v2308_v9 = vcombine.low %v2299_v13, %v2307_v37 }
 0x35f   : > { %v2635_v44 = vsel %vm2442_vm3, %v1888_v36, 0  ;;  %4723 = vmatpush3.bf16.xpose.msra.mxu0 %v2588_v30  ;;  %4724 = vmatprep.mubr.msk.bf16.mxu0 %vm5042_vm2, %v5041_v1  ;;  %v1891_v34 = vpack.i.b16 %v1890_v55, %v1889_v45  ;;  %v2729_v47 = vsel %vm2442_vm3, %v1894_v46, 0  ;;  %v1897_v50 = vpack.i.b16 %v1896_v15, %v1895_v8 }
 0x360   : > { %4729 = vmatpush3.bf16.xpose.msra.mxu1 %v2635_v44  ;;  %4734 = vmatprep.subr.bf16.mxu0 %v5041_v1  ;;  %v2420_v12 = vpack.i.b16 %v5597_v7, %v5592_v19  ;;  %v2423_v2 = vshrl.u32 %v5597_v7, 16  ;;  %v2415_v16 = vshrl.u32 %v2308_v9, 16  ;;  %v1935_v19 = vshrl.u32 %v5427_v59, 16 }
 0x361   : > { %4740 = vmatprep.subr.bf16.mxu1 %v5041_v1  ;;  %v2682_v51 = vsel %vm2442_vm3, %v1891_v34, 0 }
 0x362   : > { %v5608_v10 = vpack.i.b16 %v2423_v2, %v2422_v49 }
 0x366   : > { %4725 = vmatmul.mubr.msk.bf16.vlgmr.msra.gmra.mrb[12].mxu0 %vm2442_vm3, %v5384_v48  ;;  %v2258_v48 = vcombine.low %v2249_v40, %v2257_v60 }
 0x367   : > { %4731 = vmatmul.mubr.msk.bf16.vlgmr.msra.gmra.mrb[4].mxu1 %vm2442_vm3, %v1352_v57  ;;  %4735 = vmatpush3.bf16.xpose.msra.mxu0 %v2682_v51  ;;  %v2776_v57 = vsel %vm2442_vm3, %v1897_v50, 0 }
 0x368   : > { %4741 = vmatpush3.bf16.xpose.msra.mxu1 %v2729_v47  ;;  %4742 = vmatprep.mubr.msk.bf16.mxu1 %vm5042_vm2, %v5041_v1  ;;  %v2412_v53 = vpack.i.b16 %v2308_v9, %v2258_v48 }
 0x369   : > { %4752 = vmatprep.subr.bf16.mxu1 %v5041_v1  ;;  %4736 = vmatprep.mubr.msk.bf16.mxu0 %vm5042_vm2, %v5041_v1 }
 0x36a   : > { %4746 = vmatprep.subr.bf16.mxu0 %v5041_v1 }
 0x36e   : > { %4737 = vmatmul.mubr.msk.bf16.vlgmr.msra.gmra.mrb[16].mxu0 %vm2442_vm3, %v5409_v61  ;;  %v2414_v61 = vshrl.u32 %v2258_v48, 16 }
 0x36f   : > { %4743 = vmatmul.mubr.msk.bf16.vlgmr.msra.gmra.mrb[8].mxu1 %vm2442_vm3, %v1358_v58  ;;  %4747 = vmatpush3.bf16.xpose.msra.mxu0 %v2776_v57 }
 0x370   : > { %4753 = vmatpush3.bf16.msra.mxu1 %v2412_v53  ;;  %4748 = vmatprep.mubr.msk.bf16.mxu0 %vm5042_vm2, %v5041_v1  ;;  %v2416_v27 = vpack.i.b16 %v2415_v16, %v2414_v61 }
 0x371   : > { %4758 = vmatprep.subr.bf16.mxu0 %v5041_v1  ;;  %4754 = vmatprep.mubr.msk.bf16.mxu1 %vm5042_vm2, %v5041_v1 }
 0x372   : > { %4764 = vmatprep.subr.bf16.mxu1 %v5041_v1 }
 0x376   : > { %4749 = vmatmul.mubr.msk.bf16.vlgmr.msra.gmra.mrb[20].mxu0 %vm2442_vm3, %v5411_v62 }
 0x377   : > { %4759 = vmatpush3.bf16.msra.mxu0 %v2416_v27  ;;  %4760 = vmatprep.mubr.msk.bf16.mxu0 %vm5042_vm2, %v5041_v1 }
 0x378   : > { %4770 = vmatprep.subr.bf16.mxu0 %v5041_v1 }
 0x428   : > { %v2483_v54 = vpop.f32.mrb[4].mxu0 }
 0x429   : > { %v2577_v58 = vpop.f32.mrb[0].mxu1  ;;  %v5648_v28 = vsel %vm2821_vm4, %v2483_v54, -1e+30  ;;  %v4708_v25 = vpop.f32.mrb[5].mxu0 }
 0x42a   : > { %v4720_v62 = vpop.f32.mrb[1].mxu1  ;;  %v2486_v3 = vpop.f32.mrb[6].mxu0  ;;  %v2841_v4 = vsel %vm2840_vm5, %v5648_v28, -inf  ;;  %v5654_v17 = vsel %vm2821_vm4, %v2577_v58, -1e+30 }
 0x42b   : > { %v2580_v35 = vpop.f32.mrb[2].mxu1  ;;  %v5658_v5 = vsel %vm2821_vm4, %v2486_v3, -1e+30  ;;  %2842 = vmax.xlane.f32.xlu0 %v2841_v4  ;;  %v4709_v21 = vpop.f32.mrb[7].mxu0  ;;  %v2853_v56 = vsel %vm2840_vm5, %v5654_v17, -inf }
 0x42c   : > { %v4721_v42 = vpop.f32.mrb[3].mxu1  ;;  %v2844_v23 = vsel %vm2840_vm5, %v5658_v5, -inf  ;;  %v5664_v43 = vsel %vm2821_vm4, %v2580_v35, -1e+30 }
 0x42d   : > { %2845 = vmax.xlane.f32.xlu1 %v2844_v23  ;;  %v2856_v31 = vsel %vm2840_vm5, %v5664_v43, -inf }
 0x42f   : > { %2854 = vmax.xlane.f32.xlu0 %v2853_v56 }
 0x431   : > { %v2530_v22 = vpop.f32.mrb[8].mxu0  ;;  %2857 = vmax.xlane.f32.xlu1 %v2856_v31  ;;  %v1901_v31 = vpop.permute.xlu0 %1900 }
 0x432   : > { %v5672_v32 = vsel %vm2821_vm4, %v2530_v22, -1e+30  ;;  %v4714_v38 = vpop.f32.mrb[9].mxu0  ;;  %v1932_v7 = vpack.i.b16 %v5427_v59, %v1901_v31 }
 0x433   : > { %v2533_v33 = vpop.f32.mrb[10].mxu0  ;;  %v2847_v60 = vsel %vm2840_vm5, %v5672_v32, -inf }
 0x434   : > { %2848 = vmax.xlane.f32.xlu0 %v2847_v60  ;;  %v4715_v41 = vpop.f32.mrb[11].mxu0  ;;  %v5684_v55 = vsel %vm2821_vm4, %v2533_v33, -1e+30 }
 0x435   : > { %v2850_v49 = vsel %vm2840_vm5, %v5684_v55, -inf }
 0x439   : > { %v2624_v20 = vpop.f32.mrb[12].mxu0 }
 0x43a   : > { %v2671_v40 = vpop.f32.mrb[4].mxu1  ;;  %v4726_v26 = vpop.f32.mrb[13].mxu0  ;;  %v5696_v2 = vsel %vm2821_vm4, %v2624_v20, -1e+30 }
 0x43b   : > { %v5678_v6 = vsel %vm2821_vm4, %v2671_v40, -1e+30  ;;  %v4732_v11 = vpop.f32.mrb[5].mxu1  ;;  %v2627_v13 = vpop.f32.mrb[14].mxu0  ;;  %v2859_v9 = vsel %vm2840_vm5, %v5696_v2, -inf }
 0x43c   : > { %v2674_v37 = vpop.f32.mrb[6].mxu1  ;;  %v2865_v36 = vsel %vm2840_vm5, %v5678_v6, -inf  ;;  %v4727_v30 = vpop.f32.mrb[15].mxu0  ;;  %v5706_v50 = vsel %vm2821_vm4, %v2627_v13, -1e+30 }
 0x43d   : > { %v5688_v44 = vsel %vm2821_vm4, %v2674_v37, -1e+30  ;;  %v4733_v18 = vpop.f32.mrb[7].mxu1  ;;  %2866 = vmax.xlane.f32.xlu0 %v2865_v36  ;;  %v2862_v61 = vsel %vm2840_vm5, %v5706_v50, -inf }
 0x43e   : > { %v2868_v45 = vsel %vm2840_vm5, %v5688_v44, -inf }
 0x43f   : > { %2869 = vmax.xlane.f32.xlu1 %v2868_v45 }
 0x441   : > { %2851 = vmax.xlane.f32.xlu0 %v2850_v49  ;;  %v2718_v63 = vpop.f32.mrb[16].mxu0 }
 0x442   : > { %v2765_v34 = vpop.f32.mrb[8].mxu1  ;;  %v4738_v46 = vpop.f32.mrb[17].mxu0  ;;  %v5718_v27 = vsel %vm2821_vm4, %v2718_v63, -1e+30 }
 0x443   : > { %v4744_v51 = vpop.f32.mrb[9].mxu1  ;;  %v2721_v15 = vpop.f32.mrb[18].mxu0  ;;  %v2871_v62 = vsel %vm2840_vm5, %v5718_v27, -inf  ;;  %v5724_v35 = vsel %vm2821_vm4, %v2765_v34, -1e+30 }
 0x444   : > { %v2768_v47 = vpop.f32.mrb[10].mxu1  ;;  %v5702_v8 = vsel %vm2821_vm4, %v2721_v15, -1e+30  ;;  %v4739_v48 = vpop.f32.mrb[19].mxu0  ;;  %v2877_v4 = vsel %vm2840_vm5, %v5724_v35, -inf }
 0x445   : > { %v5710_v53 = vsel %vm2821_vm4, %v2768_v47, -1e+30  ;;  %v4745_v57 = vpop.f32.mrb[11].mxu1  ;;  %2860 = vmax.xlane.f32.xlu0 %v2859_v9  ;;  %v2874_v16 = vsel %vm2840_vm5, %v5702_v8, -inf }
 0x446   : > { %2875 = vmax.xlane.f32.xlu1 %v2874_v16  ;;  %v2880_v22 = vsel %vm2840_vm5, %v5710_v53, -inf }
 0x449   : > { %2863 = vmax.xlane.f32.xlu0 %v2862_v61  ;;  %v2812_v54 = vpop.f32.mrb[20].mxu0 }
 0x44a   : > { %v4750_v58 = vpop.f32.mrb[21].mxu0  ;;  %v5730_v42 = vsel %vm2821_vm4, %v2812_v54, -1e+30 }
 0x44b   : > { %v2815_v25 = vpop.f32.mrb[22].mxu0  ;;  %v2883_v21 = vsel %vm2840_vm5, %v5730_v42, -inf }
 0x44c   : > { %v4751_v3 = vpop.f32.mrb[23].mxu0  ;;  %v5736_v23 = vsel %vm2821_vm4, %v2815_v25, -1e+30  ;;  %v2078_v25 = vcombine.high %v1932_v7, %v5246_v24 }
 0x44d   : > { %2872 = vmax.xlane.f32.xlu0 %v2871_v62  ;;  %v2886_v56 = vsel %vm2840_vm5, %v5736_v23, -inf }
 0x451   : > { %2878 = vmax.xlane.f32.xlu0 %v2877_v4  ;;  %v1942_v4 = vshrl.u32 %v5441_v14, 16 }
 0x455   : > { %2884 = vmax.xlane.f32.xlu0 %v2883_v21 }
 0x457   : > { %1912 = vrot.lane.b32.xlu1 %v5293_v0, %s5040_s15 }
 0x459   : > { %2887 = vmax.xlane.f32.xlu0 %v2886_v56 }
 0x47b   : > { %2881 = vmax.xlane.f32.xlu1 %v2880_v22 }
 0x4b8   : > { %v2843_v38 = vpop.xlane.xlu0 %2842 }
 0x4b9   : > { %v2889_v60 = vsub.f32 %v5648_v28, %v2843_v38 }
 0x4ba   : > { %v2846_v33 = vpop.xlane.xlu1 %2845 }
 0x4bb   : > { %v2890_v52 = vsub.f32 %v5658_v5, %v2846_v33 }
 0x4bc   : > { %v2855_v41 = vpop.xlane.xlu0 %2854 }
 0x4bd   : > { %v2905_v20 = vpack.c.bf16 %v2890_v52, %v2889_v60  ;;  %v2893_v0 = vsub.f32 %v5654_v17, %v2855_v41 }
 0x4be   : > { %v2858_v40 = vpop.xlane.xlu1 %2857 }
 0x4bf   : > { %v2914_v26 = vmul.bf16 1069105081, %v2905_v20  ;;  %v2894_v11 = vsub.f32 %v5664_v43, %v2858_v40 }
 0x4c1   : > { %4903 = vpow.bf16 %v2914_v26  ;;  %v2907_v13 = vpack.c.bf16 %v2894_v11, %v2893_v0  ;;  %v2849_v36 = vpop.xlane.xlu0 %2848 }
 0x4c2   : > { %v2891_v34 = vsub.f32 %v5672_v32, %v2849_v36 }
 0x4c3   : > { %v2920_v37 = vmul.bf16 1069105081, %v2907_v13 }
 0x4c5   : > { %4905 = vpow.bf16 %v2920_v37 }
 0x4ca   : > { %v2867_v30 = vpop.xlane.xlu0 %2866 }
 0x4cb   : > { %v2897_v28 = vsub.f32 %v5678_v6, %v2867_v30 }
 0x4cc   : > { %v2870_v18 = vpop.xlane.xlu1 %2869  ;;  %v4904_v45 = vpop.eup %4903 }
 0x4cd   : > { %4755 = vmatmul.mubr.msk.bf16.vlgmr.msra.gmra.mrb[12].mxu1 %vm2840_vm5, %v4904_v45  ;;  %v2938_v5 = vunpack.c.h.bf16 %v4904_v45  ;;  %v2937_v63 = vunpack.c.l.bf16 %v4904_v45  ;;  %v2898_v17 = vsub.f32 %v5688_v44, %v2870_v18 }
 0x4ce   : > { %v2852_v49 = vpop.xlane.xlu0 %2851  ;;  %4765 = vmatpush3.bf16.msra.mxu1 %v2420_v12  ;;  %4766 = vmatprep.mubr.msk.bf16.mxu1 %vm5042_vm2, %v5041_v1  ;;  %v1934_v12 = vshrl.u32 %v1901_v31, 16  ;;  %v2085_v31 = vrot.slane %v1932_v7, %v5258_v29 }
 0x4cf   : > { %v2892_v43 = vsub.f32 %v5684_v55, %v2852_v49  ;;  %v2956_v6 = vsel %vm2840_vm5, %v2938_v5, 0.0  ;;  %v2953_v46 = vsel %vm2840_vm5, %v2937_v63, 0.0  ;;  %4776 = vmatprep.subr.bf16.mxu1 %v5041_v1  ;;  %v2909_v15 = vpack.c.bf16 %v2898_v17, %v2897_v28 }
 0x4d0   : > { %v4906_v51 = vpop.eup %4905  ;;  %2957 = vadd.xlane.f32.xlu1 %v2956_v6  ;;  %2954 = vadd.xlane.f32.xlu0 %v2953_v46  ;;  %v1936_v58 = vpack.i.b16 %v1935_v19, %v1934_v12 }
 0x4d1   : > { %v2906_v32 = vpack.c.bf16 %v2892_v43, %v2891_v34  ;;  %v2942_v55 = vunpack.c.h.bf16 %v4906_v51  ;;  %v2941_v47 = vunpack.c.l.bf16 %v4906_v51  ;;  %v2926_v61 = vmul.bf16 1069105081, %v2909_v15 }
 0x4d2   : > { %v2861_v44 = vpop.xlane.xlu0 %2860  ;;  %v2144_v52 = vcombine.high %v1936_v58, %v5246_v24  ;;  %v2151_v0 = vrot.slane %v1936_v58, %v5258_v29 }
 0x4d3   : > { %v2917_v9 = vmul.bf16 1069105081, %v2906_v32  ;;  %v5763_v48 = vpop.xlane.xlu1 %2875  ;;  %v2968_v57 = vsel %vm2840_vm5, %v2942_v55, 0.0  ;;  %v2965_v16 = vsel %vm2840_vm5, %v2941_v47, 0.0  ;;  %v2895_v59 = vsub.f32 %v5696_v2, %v2861_v44 }
 0x4d4   : > { %2969 = vadd.xlane.f32.xlu1 %v2968_v57  ;;  %2966 = vadd.xlane.f32.xlu0 %v2965_v16  ;;  %v2158_v45 = vrot.slane %v2144_v52, %v5258_v29  ;;  %v2900_v44 = vsub.f32 %v5702_v8, %v5763_v48 }
 0x4d5   : > { %4907 = vpow.bf16 %v2917_v9  ;;  %4767 = vmatmul.mubr.msk.bf16.vlgmr.msra.gmra.mrb[16].mxu1 %vm2840_vm5, %v4906_v51 }
 0x4d6   : > { %v2864_v54 = vpop.xlane.xlu0 %2863  ;;  %4778 = vmatprep.mubr.msk.bf16.mxu1 %vm5042_vm2, %v5041_v1  ;;  %4909 = vpow.bf16 %v2926_v61 }
 0x4d7   : > { %v2896_v62 = vsub.f32 %v5706_v50, %v2864_v54  ;;  %v1913_v3 = vpop.permute.xlu1 %1912  ;;  %v2092_v50 = vrot.slane %v2078_v25, %v5258_v29 }
 0x4d8   : > { %v1940_v21 = vpack.i.b16 %v1913_v3, %v5441_v14  ;;  %v1943_v56 = vshrl.u32 %v1913_v3, 16 }
 0x4d9   : > { %v2908_v22 = vpack.c.bf16 %v2896_v62, %v2895_v59 }
 0x4da   : > { %v2873_v38 = vpop.xlane.xlu0 %2872  ;;  %v1944_v33 = vpack.i.b16 %v1943_v56, %v1942_v4  ;;  %v2093_v60 = vcombine.high %v1940_v21, %v5246_v24  ;;  %v2100_v2 = vrot.slane %v1940_v21, %v5258_v29 }
 0x4db   : > { %v2923_v41 = vmul.bf16 1069105081, %v2908_v22  ;;  %v2899_v46 = vsub.f32 %v5718_v27, %v2873_v38 }
 0x4dc   : > { %v2107_v20 = vrot.slane %v2093_v60, %v5258_v29  ;;  %v2108_v40 = vcombine.low %v2085_v31, %v2100_v2  ;;  %v2109_v14 = vcombine.high %v2085_v31, %v2100_v2  ;;  %v2159_v26 = vcombine.high %v1944_v33, %v5246_v24 }
 0x4dd   : > { %4911 = vpow.bf16 %v2923_v41  ;;  %v2166_v11 = vrot.slane %v1944_v33, %v5258_v29 }
 0x4de   : > { %v2116_v13 = vrot.slane %v2108_v40, %v5273_v39  ;;  %v2123_v37 = vrot.slane %v2109_v14, %v5273_v39  ;;  %v2124_v36 = vcombine.low %v2092_v50, %v2107_v20  ;;  %v2125_v30 = vcombine.high %v2092_v50, %v2107_v20  ;;  %v5786_v18 = vpop.xlane.xlu0 %2878 }
 0x4df   : > { %v2173_v28 = vrot.slane %v2159_v26, %v5258_v29  ;;  %v2174_v49 = vcombine.low %v2151_v0, %v2166_v11  ;;  %v2175_v5 = vcombine.high %v2151_v0, %v2166_v11 }
 0x4e0   : > { %v4908_v63 = vpop.eup %4907  ;;  %v2132_v34 = vrot.slane %v2124_v36, %v5273_v39  ;;  %v2139_v17 = vrot.slane %v2125_v30, %v5273_v39  ;;  %v2310_v43 = vcombine.low %v2116_v13, %v2123_v37  ;;  %v4571_v6 = vcombine.high %v2116_v13, %v2123_v37 }
 0x4e1   : > { %v2182_v51 = vrot.slane %v2174_v49, %v5273_v39  ;;  %v2189_v15 = vrot.slane %v2175_v5, %v5273_v39  ;;  %v2190_v32 = vcombine.low %v2158_v45, %v2173_v28  ;;  %4761 = vmatmul.mubr.msk.bf16.vlgmr.msra.gmra.mrb[24].mxu0 %vm2840_vm5, %v4908_v63  ;;  %v2191_v55 = vcombine.high %v2158_v45, %v2173_v28  ;;  %v5802_v57 = vpop.eup %4909 }
 0x4e2   : > { %v2326_v47 = vcombine.low %v2132_v34, %v2139_v17  ;;  %4771 = vmatpush3.bf16.msra.mxu0 %v5608_v10  ;;  %v2885_v19 = vpop.xlane.xlu0 %2884  ;;  %v4572_v12 = vcombine.high %v2132_v34, %v2139_v17  ;;  %4772 = vmatprep.mubr.msk.bf16.mxu0 %vm5042_vm2, %v5041_v1  ;;  %v2317_v61 = vrot.slane %v2310_v43, %v5258_v29  ;;  %v2940_v25 = vunpack.c.h.bf16 %v4908_v63 }
 0x4e3   : > { %v2198_v7 = vrot.slane %v2190_v32, %v5273_v39  ;;  %v2360_v9 = vcombine.low %v2182_v51, %v2189_v15  ;;  %v4573_v27 = vcombine.high %v2182_v51, %v2189_v15  ;;  %v2205_v16 = vrot.slane %v2191_v55, %v5273_v39  ;;  %4782 = vmatprep.subr.bf16.mxu0 %v5041_v1 }
 0x4e4   : > { %v2325_v8 = vrot.slane %v4571_v6, %v5258_v29  ;;  %v2333_v48 = vrot.slane %v2326_v47, %v5258_v29  ;;  %v2910_v10 = vpack.c.bf16 %v2900_v44, %v2899_v46  ;;  %v2341_v54 = vrot.slane %v4572_v12, %v5258_v29 }
 0x4e5   : > { %v2367_v58 = vrot.slane %v2360_v9, %v5258_v29  ;;  %v2375_v59 = vrot.slane %v4573_v27, %v5258_v29  ;;  %v2376_v62 = vcombine.low %v2198_v7, %v2205_v16  ;;  %v4574_v3 = vcombine.high %v2198_v7, %v2205_v16 }
 0x4e6   : > { %v2939_v4 = vunpack.c.l.bf16 %v4908_v63  ;;  %v2888_v21 = vpop.xlane.xlu0 %2887  ;;  %v2962_v56 = vsel %vm2840_vm5, %v2940_v25, 0.0  ;;  %v2946_v22 = vunpack.c.h.bf16 %v5802_v57  ;;  %v2945_v31 = vunpack.c.l.bf16 %v5802_v57 }
 0x4e7   : > { %2963 = vadd.xlane.f32.xlu1 %v2962_v56  ;;  %v2342_v60 = vcombine.low %v2317_v61, %v2325_v8  ;;  %v2350_v2 = vcombine.low %v2333_v48, %v2341_v54  ;;  %v2383_v50 = vrot.slane %v2376_v62, %v5258_v29  ;;  %v2929_v52 = vmul.bf16 1069105081, %v2910_v10 }
 0x4e8   : > { %v4912_v38 = vpop.eup %4911  ;;  %v2959_v33 = vsel %vm2840_vm5, %v2939_v4, 0.0  ;;  %v2904_v41 = vsub.f32 %v5736_v23, %v2888_v21  ;;  %v2391_v26 = vrot.slane %v4574_v3, %v5258_v29  ;;  %v2392_v0 = vcombine.low %v2367_v58, %v2375_v59 }
 0x4e9   : > { %2960 = vadd.xlane.f32.xlu0 %v2959_v33  ;;  %4773 = vmatmul.mubr.msk.bf16.vlgmr.msra.gmra.mrb[28].mxu0 %vm2840_vm5, %v4912_v38  ;;  %v2944_v20 = vunpack.c.h.bf16 %v4912_v38  ;;  %v2943_v40 = vunpack.c.l.bf16 %v4912_v38  ;;  %v2357_v14 = vrot.slane %v2350_v2, %v5273_v39  ;;  %v2903_v11 = vsub.f32 %v5730_v42, %v2885_v19 }
 0x4ea   : > { %4784 = vmatprep.mubr.msk.bf16.mxu0 %vm5042_vm2, %v5041_v1  ;;  %v2980_v13 = vsel %vm2840_vm5, %v2946_v22, 0.0  ;;  %v2977_v37 = vsel %vm2840_vm5, %v2945_v31, 0.0  ;;  %v2349_v23 = vrot.slane %v2342_v60, %v5273_v39  ;;  %v2400_v36 = vcombine.low %v2383_v50, %v2391_v26 }
 0x4eb   : > { %2981 = vadd.xlane.f32.xlu1 %v2980_v13  ;;  %4913 = vpow.bf16 %v2929_v52  ;;  %v2912_v30 = vpack.c.bf16 %v2904_v41, %v2903_v11  ;;  %v2974_v45 = vsel %vm2840_vm5, %v2944_v20, 0.0  ;;  %v2971_v28 = vsel %vm2840_vm5, %v2943_v40, 0.0 }
 0x4ec   : > { %v2358_v49 = vcombine.low %v2349_v23, %v2357_v14  ;;  %v2399_v5 = vrot.slane %v2392_v0, %v5273_v39  ;;  %v2407_v42 = vrot.slane %v2400_v36, %v5273_v39  ;;  %v2359_v51 = vcombine.high %v2349_v23, %v2357_v14 }
 0x4ed   : > { %2978 = vadd.xlane.f32.xlu0 %v2977_v37  ;;  %v2935_v17 = vmul.bf16 1069105081, %v2912_v30  ;;  %v2901_v9 = vsub.f32 %v5724_v35, %v5786_v18 }
 0x4ee   : > { %v2408_v63 = vcombine.low %v2399_v5, %v2407_v42  ;;  %v2409_v34 = vcombine.high %v2399_v5, %v2407_v42  ;;  %v2430_v6 = vshrl.u32 %v2358_v49, 16  ;;  %v2438_v55 = vshrl.u32 %v2359_v51, 16 }
 0x4ef   : > { %2975 = vadd.xlane.f32.xlu1 %v2974_v45  ;;  %4915 = vpow.bf16 %v2935_v17 }
 0x4f0   : > { %v2428_v43 = vpack.i.b16 %v2408_v63, %v2358_v49  ;;  %v2431_v46 = vshrl.u32 %v2408_v63, 16  ;;  %v2439_v32 = vshrl.u32 %v2409_v34, 16  ;;  %v2436_v44 = vpack.i.b16 %v2409_v34, %v2359_v51 }
 0x4f1   : > { %2972 = vadd.xlane.f32.xlu0 %v2971_v28 }
 0x4f2   : > { %4777 = vmatpush3.bf16.msra.mxu1 %v2428_v43  ;;  %v2432_v15 = vpack.i.b16 %v2431_v46, %v2430_v6  ;;  %v2440_v19 = vpack.i.b16 %v2439_v32, %v2438_v55 }
 0x4f3   : > { %4788 = vmatprep.subr.bf16.mxu1 %v5041_v1 }
 0x4f4   : > { %4783 = vmatpush3.bf16.msra.mxu0 %v2432_v15 }
 0x4f5   : > { %4779 = vmatmul.mubr.msk.bf16.vlgmr.msra.gmra.mrb[20].mxu1 %vm2840_vm5, %v5802_v57  ;;  %4794 = vmatprep.subr.bf16.mxu0 %v5041_v1 }
 0x4f6   : > { %v4914_v47 = vpop.eup %4913  ;;  %4789 = vmatpush3.bf16.msra.mxu1 %v2436_v44  ;;  %4790 = vmatprep.mubr.msk.bf16.mxu1 %vm5042_vm2, %v5041_v1 }
 0x4f7   : > { %4785 = vmatmul.mubr.msk.bf16.vlgmr.msra.gmra.mrb[32].mxu0 %vm2840_vm5, %v4914_v47  ;;  %v2948_v54 = vunpack.c.h.bf16 %v4914_v47  ;;  %v2947_v58 = vunpack.c.l.bf16 %v4914_v47 }
 0x4f8   : > { %4795 = vmatpush3.bf16.msra.mxu0 %v2440_v19  ;;  %4796 = vmatprep.mubr.msk.bf16.mxu0 %vm5042_vm2, %v5041_v1 }
 0x4f9   : > { %v2986_v35 = vsel %vm2840_vm5, %v2948_v54, 0.0 }
 0x4fa   : > { %v4916_v7 = vpop.eup %4915 }
 0x4fb   : > { %v2952_v18 = vunpack.c.h.bf16 %v4916_v7  ;;  %v2951_v25 = vunpack.c.l.bf16 %v4916_v7 }
 0x4fd   : > { %v2998_v59 = vsel %vm2840_vm5, %v2952_v18, 0.0  ;;  %v2995_v62 = vsel %vm2840_vm5, %v2951_v25, 0.0 }
 0x4ff   : > { %4797 = vmatmul.mubr.msk.bf16.vlgmr.msra.gmra.mrb[36].mxu0 %vm2840_vm5, %v4916_v7 }
 0x508   : > { %v2882_v12 = vpop.xlane.xlu1 %2881 }
 0x509   : > { %v2902_v27 = vsub.f32 %v5710_v53, %v2882_v12  ;;  %v2983_v53 = vsel %vm2840_vm5, %v2947_v58, 0.0 }
 0x50b   : > { %v2911_v57 = vpack.c.bf16 %v2902_v27, %v2901_v9 }
 0x50d   : > { %v2932_v16 = vmul.bf16 1069105081, %v2911_v57 }
 0x50f   : > { %4917 = vpow.bf16 %v2932_v16 }
 0x51a   : > { %v4918_v61 = vpop.eup %4917 }
 0x51b   : > { %4791 = vmatmul.mubr.msk.bf16.vlgmr.msra.gmra.mrb[24].mxu1 %vm2840_vm5, %v4918_v61  ;;  %v2950_v8 = vunpack.c.h.bf16 %v4918_v61  ;;  %v2949_v48 = vunpack.c.l.bf16 %v4918_v61 }
 0x51d   : > { %v2992_v10 = vsel %vm2840_vm5, %v2950_v8, 0.0  ;;  %v2989_v1 = vsel %vm2840_vm5, %v2949_v48, 0.0 }
 0x51e   : > { %2993 = vadd.xlane.f32.xlu1 %v2992_v10  ;;  %2990 = vadd.xlane.f32.xlu0 %v2989_v1 }
 0x522   : > { %2987 = vadd.xlane.f32.xlu1 %v2986_v35  ;;  %2984 = vadd.xlane.f32.xlu0 %v2983_v53 }
 0x526   : > { %2999 = vadd.xlane.f32.xlu1 %v2998_v59  ;;  %2996 = vadd.xlane.f32.xlu0 %v2995_v62 }
 0x55d   : > { %v2958_v3 = vpop.xlane.xlu1 %2957  ;;  %v2955_v4 = vpop.xlane.xlu0 %2954 }
 0x55e   : > { %4919 = vrcp.f32 %v2958_v3 }
 0x55f   : > { %4921 = vrcp.f32 %v2955_v4 }
 0x561   : > { %v2970_v21 = vpop.xlane.xlu1 %2969  ;;  %v2967_v56 = vpop.xlane.xlu0 %2966 }
 0x562   : > { %4923 = vrcp.f32 %v2970_v21 }
 0x563   : > { %4925 = vrcp.f32 %v2967_v56 }
 0x568   : > { %v4920_v31 = vpop.eup %4919 }
 0x569   : > { %v4922_v33 = vpop.eup %4921 }
 0x56c   : > { %v4924_v26 = vpop.eup %4923 }
 0x56d   : > { %v4926_v13 = vpop.eup %4925 }
 0x574   : > { %v2964_v2 = vpop.xlane.xlu1 %2963 }
 0x575   : > { %4927 = vrcp.f32 %v2964_v2 }
 0x576   : > { %v2961_v20 = vpop.xlane.xlu0 %2960 }
 0x577   : > { %4929 = vrcp.f32 %v2961_v20 }
 0x578   : > { %v2982_v0 = vpop.xlane.xlu1 %2981 }
 0x57a   : > { %v2979_v37 = vpop.xlane.xlu0 %2978 }
 0x57c   : > { %v2976_v49 = vpop.xlane.xlu1 %2975 }
 0x57d   : > { %4931 = vrcp.f32 %v2976_v49 }
 0x57e   : > { %v2973_v5 = vpop.xlane.xlu0 %2972 }
 0x57f   : > { %4933 = vrcp.f32 %v2973_v5  ;;  %v4928_v63 = vpop.eup %4927 }
 0x580   : > { %4935 = vrcp.f32 %v2982_v0 }
 0x581   : > { %v4930_v17 = vpop.eup %4929  ;;  %4937 = vrcp.f32 %v2979_v37 }
 0x587   : > { %v4932_v12 = vpop.eup %4931 }
 0x589   : > { %v4934_v16 = vpop.eup %4933 }
 0x5a0   : > { %v3038_v22 = vpop.f32.mrb[12].mxu1 }
 0x5a1   : > { %v4756_v38 = vpop.f32.mrb[13].mxu1  ;;  %v3369_v50 = vmul.f32 %v4922_v33, %v3038_v22 }
 0x5a2   : > { %v3041_v60 = vpop.f32.mrb[14].mxu1 }
 0x5a3   : > { %v3370_v52 = vmul.f32 %v4920_v31, %v3041_v60  ;;  %v4757_v41 = vpop.f32.mrb[15].mxu1 }
 0x5a5   : > { %v3385_v40 = vpack.c.bf16 %v3370_v52, %v3369_v50 }
 0x5a7   : > { %v3397_v55 = vshrl.u32 %v3385_v40, 16 }
 0x5a8   : > { %v3126_v14 = vpop.f32.mrb[16].mxu1 }
 0x5a9   : > { %v4768_v11 = vpop.f32.mrb[17].mxu1  ;;  %v3373_v36 = vmul.f32 %v4926_v13, %v3126_v14  ;;  %v4936_v14 = vpop.eup %4935 }
 0x5aa   : > { %v3129_v23 = vpop.f32.mrb[18].mxu1 }
 0x5ab   : > { %v3374_v30 = vmul.f32 %v4924_v26, %v3129_v23  ;;  %v4769_v45 = vpop.f32.mrb[19].mxu1  ;;  %v5851_v6 = vpop.xlane.xlu1 %2993 }
 0x5ac   : > { %v5853_v32 = vpop.xlane.xlu0 %2990  ;;  %v4938_v23 = vpop.eup %4937 }
 0x5ad   : > { %v3387_v28 = vpack.c.bf16 %v3374_v30, %v3373_v36 }
 0x5af   : > { %v2988_v9 = vpop.xlane.xlu1 %2987  ;;  %v3405_v35 = vshrl.u32 %v3387_v28, 16 }
 0x5b0   : > { %v2985_v8 = vpop.xlane.xlu0 %2984 }
 0x5b1   : > { %4939 = vrcp.f32 %v2985_v8 }
 0x5b2   : > { %4941 = vrcp.f32 %v2988_v9 }
 0x5b3   : > { %v3000_v53 = vpop.xlane.xlu1 %2999 }
 0x5b4   : > { %v3082_v42 = vpop.f32.mrb[24].mxu0  ;;  %v2997_v62 = vpop.xlane.xlu0 %2996  ;;  %4943 = vrcp.f32 %v3000_v53 }
 0x5b5   : > { %v4762_v34 = vpop.f32.mrb[25].mxu0  ;;  %v3371_v46 = vmul.f32 %v4930_v17, %v3082_v42  ;;  %4945 = vrcp.f32 %v2997_v62 }
 0x5b6   : > { %v3085_v43 = vpop.f32.mrb[26].mxu0  ;;  %4947 = vrcp.f32 %v5851_v6 }
 0x5b7   : > { %v3372_v51 = vmul.f32 %v4928_v63, %v3085_v43  ;;  %v4763_v15 = vpop.f32.mrb[27].mxu0  ;;  %4949 = vrcp.f32 %v5853_v32 }
 0x5b9   : > { %v3386_v44 = vpack.c.bf16 %v3372_v51, %v3371_v46 }
 0x5bb   : > { %v3395_v47 = vpack.i.b16 %v3386_v44, %v3385_v40  ;;  %v3398_v19 = vshrl.u32 %v3386_v44, 16  ;;  %v4940_v5 = vpop.eup %4939 }
 0x5bc   : > { %v3170_v7 = vpop.f32.mrb[28].mxu0 }
 0x5bd   : > { %v3399_v27 = vpack.i.b16 %v3398_v19, %v3397_v55  ;;  %v4774_v57 = vpop.f32.mrb[29].mxu0  ;;  %v3375_v48 = vmul.f32 %v4934_v16, %v3170_v7  ;;  %v3425_v58 = vcombine.high %v3395_v47, %v5246_v24  ;;  %v3432_v59 = vrot.slane %v3395_v47, %v5258_v29  ;;  %v4942_v7 = vpop.eup %4941 }
 0x5be   : > { %v3173_v61 = vpop.f32.mrb[30].mxu0 }
 0x5bf   : > { %v3376_v10 = vmul.f32 %v4932_v12, %v3173_v61  ;;  %v4775_v1 = vpop.f32.mrb[31].mxu0  ;;  %v3439_v56 = vrot.slane %v3425_v58, %v5258_v29  ;;  %v3491_v22 = vcombine.high %v3399_v27, %v5246_v24  ;;  %v3498_v2 = vrot.slane %v3399_v27, %v5258_v29 }
 0x5c1   : > { %v3388_v54 = vpack.c.bf16 %v3376_v10, %v3375_v48  ;;  %v3505_v26 = vrot.slane %v3491_v22, %v5258_v29 }
 0x5c3   : > { %v3403_v18 = vpack.i.b16 %v3388_v54, %v3387_v28  ;;  %v3406_v25 = vshrl.u32 %v3388_v54, 16  ;;  %v4944_v54 = vpop.eup %4943 }
 0x5c5   : > { %v3407_v3 = vpack.i.b16 %v3406_v25, %v3405_v35  ;;  %v3440_v4 = vcombine.high %v3403_v18, %v5246_v24  ;;  %v3447_v21 = vrot.slane %v3403_v18, %v5258_v29 }
 0x5c7   : > { %v3454_v31 = vrot.slane %v3440_v4, %v5258_v29  ;;  %v3455_v38 = vcombine.low %v3432_v59, %v3447_v21  ;;  %v3456_v33 = vcombine.high %v3432_v59, %v3447_v21  ;;  %v3506_v60 = vcombine.high %v3407_v3, %v5246_v24 }
 0x5c8   : > { %v3513_v50 = vrot.slane %v3407_v3, %v5258_v29  ;;  %v3214_v37 = vpop.f32.mrb[20].mxu1  ;;  %v4946_v3 = vpop.eup %4945 }
 0x5c9   : > { %v3463_v52 = vrot.slane %v3455_v38, %v5273_v39  ;;  %v3470_v41 = vrot.slane %v3456_v33, %v5273_v39  ;;  %v3471_v20 = vcombine.low %v3439_v56, %v3454_v31  ;;  %v3472_v40 = vcombine.high %v3439_v56, %v3454_v31  ;;  %v4780_v49 = vpop.f32.mrb[21].mxu1 }
 0x5ca   : > { %v3520_v0 = vrot.slane %v3506_v60, %v5258_v29  ;;  %v3521_v11 = vcombine.low %v3498_v2, %v3513_v50  ;;  %v3522_v13 = vcombine.high %v3498_v2, %v3513_v50  ;;  %v3217_v43 = vpop.f32.mrb[22].mxu1  ;;  %v3258_v46 = vpop.f32.mrb[32].mxu0  ;;  %v3377_v51 = vmul.f32 %v4938_v23, %v3214_v37 }
 0x5cb   : > { %v3479_v36 = vrot.slane %v3471_v20, %v5273_v39  ;;  %v3486_v30 = vrot.slane %v3472_v40, %v5273_v39  ;;  %v3689_v45 = vcombine.low %v3463_v52, %v3470_v41  ;;  %v4591_v28 = vcombine.high %v3463_v52, %v3470_v41  ;;  %v4781_v55 = vpop.f32.mrb[23].mxu1  ;;  %v4786_v47 = vpop.f32.mrb[33].mxu0 }
 0x5cc   : > { %v3529_v42 = vrot.slane %v3521_v11, %v5273_v39  ;;  %v3536_v63 = vrot.slane %v3522_v13, %v5273_v39  ;;  %v3537_v34 = vcombine.low %v3505_v26, %v3520_v0  ;;  %v3538_v17 = vcombine.high %v3505_v26, %v3520_v0  ;;  %v3261_v27 = vpop.f32.mrb[34].mxu0 }
 0x5cd   : > { %v3378_v15 = vmul.f32 %v4936_v14, %v3217_v43  ;;  %v3379_v44 = vmul.f32 %v4940_v5, %v3258_v46  ;;  %v3696_v19 = vrot.slane %v3689_v45, %v5258_v29  ;;  %v3704_v57 = vrot.slane %v4591_v28, %v5258_v29  ;;  %v4787_v48 = vpop.f32.mrb[35].mxu0 }
 0x5ce   : > { %v3545_v12 = vrot.slane %v3537_v34, %v5273_v39  ;;  %v3552_v9 = vrot.slane %v3538_v17, %v5273_v39  ;;  %v3705_v16 = vcombine.low %v3479_v36, %v3486_v30  ;;  %v3380_v8 = vmul.f32 %v4942_v7, %v3261_v27 }
 0x5cf   : > { %v3389_v61 = vpack.c.bf16 %v3378_v15, %v3377_v51  ;;  %v4592_v10 = vcombine.high %v3479_v36, %v3486_v30  ;;  %v3739_v1 = vcombine.low %v3529_v42, %v3536_v63  ;;  %v3721_v35 = vcombine.low %v3696_v19, %v3704_v57 }
 0x5d0   : > { %v3712_v58 = vrot.slane %v3705_v16, %v5258_v29  ;;  %v4593_v53 = vcombine.high %v3529_v42, %v3536_v63  ;;  %v3755_v18 = vcombine.low %v3545_v12, %v3552_v9  ;;  %v3390_v25 = vpack.c.bf16 %v3380_v8, %v3379_v44  ;;  %v4948_v44 = vpop.eup %4947 }
 0x5d1   : > { %v3720_v59 = vrot.slane %v4592_v10, %v5258_v29  ;;  %v3746_v62 = vrot.slane %v3739_v1, %v5258_v29  ;;  %v4594_v56 = vcombine.high %v3545_v12, %v3552_v9  ;;  %v3413_v22 = vshrl.u32 %v3389_v61, 16  ;;  %v4950_v47 = vpop.eup %4949 }
 0x5d2   : > { %v3754_v4 = vrot.slane %v4593_v53, %v5258_v29  ;;  %v3762_v21 = vrot.slane %v3755_v18, %v5258_v29  ;;  %v3411_v31 = vpack.i.b16 %v3390_v25, %v3389_v61  ;;  %v3414_v38 = vshrl.u32 %v3390_v25, 16  ;;  %v3346_v60 = vpop.f32.mrb[36].mxu0 }
 0x5d3   : > { %v3729_v33 = vcombine.low %v3712_v58, %v3720_v59  ;;  %v3770_v2 = vrot.slane %v4594_v56, %v5258_v29  ;;  %v4798_v41 = vpop.f32.mrb[37].mxu0  ;;  %v3728_v40 = vrot.slane %v3721_v35, %v5273_v39  ;;  %v3383_v0 = vmul.f32 %v4946_v3, %v3346_v60 }
 0x5d4   : > { %v3771_v50 = vcombine.low %v3746_v62, %v3754_v4  ;;  %v3415_v52 = vpack.i.b16 %v3414_v38, %v3413_v22  ;;  %v3349_v20 = vpop.f32.mrb[38].mxu0  ;;  %v3557_v57 = vcombine.high %v3411_v31, %v5246_v24  ;;  %v3564_v48 = vrot.slane %v3411_v31, %v5258_v29 }
 0x5d5   : > { %v3736_v14 = vrot.slane %v3729_v33, %v5273_v39  ;;  %v3779_v26 = vcombine.low %v3762_v21, %v3770_v2  ;;  %v3384_v11 = vmul.f32 %v4944_v54, %v3349_v20  ;;  %v4799_v13 = vpop.f32.mrb[39].mxu0 }
 0x5d6   : > { %v3778_v23 = vrot.slane %v3771_v50, %v5273_v39  ;;  %v3571_v1 = vrot.slane %v3557_v57, %v5258_v29  ;;  %v3623_v54 = vcombine.high %v3415_v52, %v5246_v24  ;;  %v3630_v25 = vrot.slane %v3415_v52, %v5258_v29 }
 0x5d7   : > { %v3738_v37 = vcombine.high %v3728_v40, %v3736_v14  ;;  %v3786_v36 = vrot.slane %v3779_v26, %v5273_v39  ;;  %v5887_v30 = vcombine.low %v3728_v40, %v3736_v14  ;;  %v3392_v45 = vpack.c.bf16 %v3384_v11, %v3383_v0 }
 0x5d8   : > { %v3637_v56 = vrot.slane %v3623_v54, %v5258_v29 }
 0x5d9   : > { %v3788_v28 = vcombine.high %v3778_v23, %v3786_v36  ;;  %v5889_v49 = vcombine.low %v3778_v23, %v3786_v36  ;;  %v3892_v5 = vshrl.u32 %v5887_v30, 16  ;;  %v3898_v42 = vshrl.u32 %v3738_v37, 16  ;;  %v4883_v36 = vld [vmem:[%s6088_s16] sm:$0xff]  }
 0x5da   : > { %v3422_v16 = vshrl.u32 %v3392_v45, 16  ;;  %4800 = vmatprep.subr.bf16.mxu1 %v4883_v36 }
 0x5db   : > { %v3897_v63 = vpack.i.b16 %v3788_v28, %v3738_v37  ;;  %v3893_v34 = vshrl.u32 %v5889_v49, 16  ;;  %v3899_v17 = vshrl.u32 %v3788_v28, 16  ;;  %v3891_v43 = vpack.i.b16 %v5889_v49, %v5887_v30  ;;  %4801 = vmatpush3.bf16.msra.mxu1 %v4883_v36  ;;  %v4599_v30 = vld [vmem:[%s6089_s22] ss:$0 sm:$0xff] }
 0x5dd   : > { %3917 = vrot.lane.b32.xlu1 %v3897_v63, %s5043_s28  ;;  %v3894_v46 = vpack.i.b16 %v3893_v34, %v3892_v5  ;;  %v3900_v51 = vpack.i.b16 %v3899_v17, %v3898_v42 }
 0x5df   : > { %3913 = vrot.lane.b32.xlu0 %v3894_v46, %s5044_s29 }
 0x5e3   : > { %3921 = vrot.lane.b32.xlu0 %v3900_v51, %s5045_s13 }
 0x5ee   : > { %v3302_v15 = vpop.f32.mrb[24].mxu1 }
 0x5ef   : > { %v4792_v55 = vpop.f32.mrb[25].mxu1  ;;  %v3381_v7 = vmul.f32 %v4950_v47, %v3302_v15 }
 0x5f0   : > { %v3305_v19 = vpop.f32.mrb[26].mxu1 }
 0x5f1   : > { %v3382_v12 = vmul.f32 %v4948_v44, %v3305_v19  ;;  %v4793_v9 = vpop.f32.mrb[27].mxu1  ;;  %v4884_v19 = vld [vmem:[%s6088_s16 + $0x8] sm:$0xff]  }
 0x5f2   : > { %4802 = vmatprep.subr.bf16.mxu1 %v4884_v19 }
 0x5f3   : > { %v3391_v27 = vpack.c.bf16 %v3382_v12, %v3381_v7  ;;  %4803 = vmatpush3.bf16.msra.mxu1 %v4884_v19 }
 0x5f5   : > { %v3419_v61 = vpack.i.b16 %v3392_v45, %v3391_v27  ;;  %v3421_v8 = vshrl.u32 %v3391_v27, 16 }
 0x5f7   : > { %v3423_v10 = vpack.i.b16 %v3422_v16, %v3421_v8  ;;  %v3572_v6 = vcombine.high %v3419_v61, %v5246_v24  ;;  %v3579_v32 = vrot.slane %v3419_v61, %v5258_v29 }
 0x5f9   : > { %v3586_v58 = vrot.slane %v3572_v6, %v5258_v29  ;;  %v3587_v35 = vcombine.low %v3564_v48, %v3579_v32  ;;  %v3588_v53 = vcombine.high %v3564_v48, %v3579_v32  ;;  %v3638_v18 = vcombine.high %v3423_v10, %v5246_v24 }
 0x5fa   : > { %v3645_v59 = vrot.slane %v3423_v10, %v5258_v29 }
 0x5fb   : > { %v3595_v62 = vrot.slane %v3587_v35, %v5273_v39  ;;  %v3602_v3 = vrot.slane %v3588_v53, %v5273_v39  ;;  %v3603_v4 = vcombine.low %v3571_v1, %v3586_v58  ;;  %v3604_v21 = vcombine.high %v3571_v1, %v3586_v58 }
 0x5fc   : > { %v3652_v22 = vrot.slane %v3638_v18, %v5258_v29  ;;  %v3653_v31 = vcombine.low %v3630_v25, %v3645_v59  ;;  %v3654_v38 = vcombine.high %v3630_v25, %v3645_v59 }
 0x5fd   : > { %v3611_v33 = vrot.slane %v3603_v4, %v5273_v39  ;;  %v3618_v24 = vrot.slane %v3604_v21, %v5273_v39  ;;  %v3789_v60 = vcombine.low %v3595_v62, %v3602_v3  ;;  %v4595_v2 = vcombine.high %v3595_v62, %v3602_v3 }
 0x5fe   : > { %v3661_v50 = vrot.slane %v3653_v31, %v5273_v39  ;;  %v3668_v52 = vrot.slane %v3654_v38, %v5273_v39  ;;  %v3669_v41 = vcombine.low %v3637_v56, %v3652_v22  ;;  %v3670_v20 = vcombine.high %v3637_v56, %v3652_v22 }
 0x5ff   : > { %v3796_v40 = vrot.slane %v3789_v60, %v5258_v29  ;;  %v3804_v14 = vrot.slane %v4595_v2, %v5258_v29  ;;  %v3805_v26 = vcombine.low %v3611_v33, %v3618_v24  ;;  %v4596_v0 = vcombine.high %v3611_v33, %v3618_v24  ;;  %v4975_v24 = vld [vmem:[#allocation2] sm:$0xff] }
 0x600   : > { %v3677_v11 = vrot.slane %v3669_v41, %v5273_v39  ;;  %v3684_v13 = vrot.slane %v3670_v20, %v5273_v39  ;;  %v3839_v37 = vcombine.low %v3661_v50, %v3668_v52  ;;  %v4597_v23 = vcombine.high %v3661_v50, %v3668_v52  ;;  %v4976_v50 = vld [vmem:[#allocation2 + $0x10] sm:$0xff]  ;;  %v4977_v20 = vld [vmem:[#allocation2 + $0x8] sm:$0xff] }
 0x601   : > { %v3812_v45 = vrot.slane %v3805_v26, %v5258_v29  ;;  %v3820_v28 = vrot.slane %v4596_v0, %v5258_v29  ;;  %v3821_v5 = vcombine.low %v3796_v40, %v3804_v14  ;;  %v4978_v0 = vld [vmem:[#allocation2 + $0x18] sm:$0xff] }
 0x602   : > { %v3846_v42 = vrot.slane %v3839_v37, %v5258_v29  ;;  %v3854_v63 = vrot.slane %v4597_v23, %v5258_v29  ;;  %v3855_v34 = vcombine.low %v3677_v11, %v3684_v13  ;;  %v4598_v17 = vcombine.high %v3677_v11, %v3684_v13 }
 0x603   : > { %v3829_v46 = vcombine.low %v3812_v45, %v3820_v28  ;;  %v3828_v55 = vrot.slane %v3821_v5, %v5273_v39 }
 0x604   : > { %v3862_v51 = vrot.slane %v3855_v34, %v5258_v29  ;;  %v3870_v15 = vrot.slane %v4598_v17, %v5258_v29  ;;  %v3871_v44 = vcombine.low %v3846_v42, %v3854_v63 }
 0x605   : > { %v3836_v47 = vrot.slane %v3829_v46, %v5273_v39 }
 0x606   : > { %v3879_v7 = vcombine.low %v3862_v51, %v3870_v15  ;;  %v3878_v27 = vrot.slane %v3871_v44, %v5273_v39 }
 0x607   : > { %v3838_v12 = vcombine.high %v3828_v55, %v3836_v47  ;;  %v3837_v9 = vcombine.low %v3828_v55, %v3836_v47 }
 0x608   : > { %v3886_v57 = vrot.slane %v3879_v7, %v5273_v39 }
 0x609   : > { %v3904_v8 = vshrl.u32 %v3837_v9, 16  ;;  %v3910_v48 = vshrl.u32 %v3838_v12, 16 }
 0x60a   : > { %v3888_v16 = vcombine.high %v3878_v27, %v3886_v57  ;;  %v3887_v61 = vcombine.low %v3878_v27, %v3886_v57  ;;  %v4885_v57 = vld [vmem:[%s5181_s3] sm:$0xff]  }
 0x60b   : > { %4808 = vmatprep.subr.bf16.mxu0 %v4885_v57 }
 0x60c   : > { %v3909_v29 = vpack.i.b16 %v3888_v16, %v3838_v12  ;;  %v3905_v10 = vshrl.u32 %v3887_v61, 16  ;;  %v3911_v6 = vshrl.u32 %v3888_v16, 16  ;;  %v3903_v32 = vpack.i.b16 %v3887_v61, %v3837_v9  ;;  %v4886_v16 = vld [vmem:[%s5181_s3 + $0x8] sm:$0xff]   ;;  %4809 = vmatpush3.bf16.msra.mxu0 %v4885_v57 }
 0x60d   : > { %4810 = vmatprep.subr.bf16.mxu0 %v4886_v16 }
 0x60e   : > { %3919 = vrot.lane.b32.xlu1 %v3909_v29, %s5043_s28  ;;  %v3906_v1 = vpack.i.b16 %v3905_v10, %v3904_v8  ;;  %v3912_v54 = vpack.i.b16 %v3911_v6, %v3910_v48 }
 0x610   : > { %4811 = vmatpush3.bf16.msra.mxu0 %v4886_v16 }
 0x612   : > { %3915 = vrot.lane.b32.xlu1 %v3906_v1, %s5044_s29 }
 0x616   : > { %3923 = vrot.lane.b32.xlu1 %v3912_v54, %s5045_s13 }
 0x64f   : > { %v3918_v35 = vpop.permute.xlu1 %3917 }
 0x651   : > { %v3914_v58 = vpop.permute.xlu0 %3913 }
 0x652   : > { %v3927_v39 = vsel %vm2442_vm3, %v3891_v43, %v3914_v58 }
 0x653   : > { %v3932_v18 = vsel %vm2840_vm5, %v3927_v39, %v3918_v35 }
 0x655   : > { %v3922_v53 = vpop.permute.xlu0 %3921 }
 0x656   : > { %v3937_v25 = vsel %vm3935_vm6, %v3932_v18, %v3922_v53  ;;  %v4604_v18 = vld [vmem:[%s621_s27] ss:$0 sm:$0xff] }
 0x657   : > { %4804 = vmatprep.mubr.msk.bf16.mxu1 %vm664_vm1, %v3937_v25 }
 0x680   : > { %v3920_v59 = vpop.permute.xlu1 %3919 }
 0x684   : > { %v3916_v62 = vpop.permute.xlu1 %3915 }
 0x685   : > { %v3930_v3 = vsel %vm2442_vm3, %v3903_v32, %v3916_v62 }
 0x686   : > { %v3934_v21 = vsel %vm2840_vm5, %v3930_v3, %v3920_v59 }
 0x688   : > { %v3924_v4 = vpop.permute.xlu1 %3923 }
 0x689   : > { %v3939_v56 = vsel %vm3935_vm6, %v3934_v21, %v3924_v4  ;;  %v4605_v21 = vld [vmem:[%s624_s23] ss:$0 sm:$0xff] }
 0x68a   : > { %4805 = vmatmul.mubr.msk.bf16.vlgmr.msra.gmra.mrb[28].mxu1 %vm664_vm1, %v3939_v56 }
 0x75d   : > { %v4806_v49 = vpop.f32.mrb[28].mxu1 }
 0x75e   : > { %v4001_v43 = vpop.f32.mrb[29].mxu1  ;;  %v4010_v22 = vadd.f32 %v4806_v49, %v4599_v30 }
 0x75f   : > { %v4002_v31 = vadd.f32 %v4599_v30, %v4001_v43  ;;  %v4807_v38 = vpop.f32.mrb[30].mxu1 }
 0x760   : > { %v4004_v33 = vpop.f32.mrb[31].mxu1  ;;  %v5953_v52 = vadd.f32 %v4976_v50, %v4010_v22  ;;  %v4013_v41 = vadd.f32 %v4807_v38, %v4599_v30 }
 0x761   : > { %v5951_v60 = vadd.f32 %v4975_v24, %v4002_v31  ;;  %v4005_v2 = vadd.f32 %v4599_v30, %v4004_v33 }
 0x762   : > { %v5961_v11 = vadd.f32 %v4978_v0, %v4013_v41  ;;  %v4026_v13 = vsel %vm664_vm1, %v5953_v52, 0.0  ;;  %v4890_v0 = vld [vmem:[%s5191_s17 + $0x18] sm:$0xff]  }
 0x763   : > { %v5955_v40 = vadd.f32 %v4977_v20, %v4005_v2  ;;  %v4020_v14 = vsel %vm664_vm1, %v5951_v60, 0.0  ;;  %v4887_v20 = vld [vmem:[%s5191_s17] sm:$0xff]  }
 0x764   : > { %4021 = vadd.xlane.f32.xlu0 %v4020_v14  ;;  %v4029_v37 = vsel %vm664_vm1, %v5961_v11, 0.0  ;;  %4816 = vmatprep.subr.bf16.mxu1 %v4887_v20  ;;  %v4888_v14 = vld [vmem:[%s5191_s17 + $0x8] sm:$0xff]  }
 0x765   : > { %v4023_v26 = vsel %vm664_vm1, %v5955_v40, 0.0  ;;  %4817 = vmatpush3.bf16.msra.mxu1 %v4887_v20 }
 0x766   : > { %4024 = vadd.xlane.f32.xlu1 %v4023_v26  ;;  %4818 = vmatprep.subr.bf16.mxu1 %v4888_v14  ;;  %v4889_v26 = vld [vmem:[%s5191_s17 + $0x10] sm:$0xff]  }
 0x768   : > { %4027 = vadd.xlane.f32.xlu0 %v4026_v13  ;;  %v4891_v13 = vld [vmem:[%s5191_s17 + $0x20] sm:$0xff]  }
 0x769   : > { %4819 = vmatpush3.bf16.msra.mxu1 %v4888_v14 }
 0x76a   : > { %4820 = vmatprep.subr.bf16.mxu1 %v4889_v26 }
 0x76c   : > { %4030 = vadd.xlane.f32.xlu0 %v4029_v37  ;;  %v4892_v37 = vld [vmem:[%s5191_s17 + $0x28] sm:$0xff]  }
 0x76d   : > { %4821 = vmatpush3.bf16.msra.mxu1 %v4889_v26 }
 0x76e   : > { %4822 = vmatprep.subr.bf16.mxu1 %v4890_v0 }
 0x771   : > { %4823 = vmatpush3.bf16.msra.mxu1 %v4890_v0 }
 0x772   : > { %4824 = vmatprep.subr.bf16.mxu1 %v4891_v13 }
 0x775   : > { %4825 = vmatpush3.bf16.msra.mxu1 %v4891_v13 }
 0x776   : > { %4826 = vmatprep.subr.bf16.mxu1 %v4892_v37 }
 0x779   : > { %4827 = vmatpush3.bf16.msra.mxu1 %v4892_v37 }
 0x7f1   : > { %v4022_v23 = vpop.xlane.xlu0 %4021 }
 0x7f2   : > { %v4032_v36 = vmul.f32 0.03125, %v4022_v23  ;;  %v4893_v23 = vld [vmem:[%s5191_s17 + $0x30] sm:$0xff]  }
 0x7f3   : > { %v4025_v45 = vpop.xlane.xlu1 %4024  ;;  %4828 = vmatprep.subr.bf16.mxu1 %v4893_v23 }
 0x7f4   : > { %v4036_v28 = vsub.f32 %v5951_v60, %v4032_v36  ;;  %v4033_v5 = vmul.f32 0.03125, %v4025_v45  ;;  %v4894_v36 = vld [vmem:[%s5191_s17 + $0x38] sm:$0xff]   ;;  %4829 = vmatpush3.bf16.msra.mxu1 %v4893_v23  ;;  %v4606_v45 = vld [vmem:[%s632_s5] ss:$0 sm:$0xff] }
 0x7f5   : > { %v4028_v42 = vpop.xlane.xlu0 %4027  ;;  %4830 = vmatprep.subr.bf16.mxu1 %v4894_v36 }
 0x7f6   : > { %v4037_v63 = vsub.f32 %v5955_v40, %v4033_v5  ;;  %v4034_v34 = vmul.f32 0.03125, %v4028_v42  ;;  %v4040_v17 = vmul.f32 %v4036_v28, %v4036_v28 }
 0x7f8   : > { %v4038_v46 = vsub.f32 %v5953_v52, %v4034_v34  ;;  %v4044_v51 = vsel %vm664_vm1, %v4040_v17, 0.0  ;;  %v4041_v15 = vmul.f32 %v4037_v63, %v4037_v63  ;;  %4831 = vmatpush3.bf16.msra.mxu1 %v4894_v36 }
 0x7f9   : > { %4045 = vadd.xlane.f32.xlu0 %v4044_v51  ;;  %v4031_v44 = vpop.xlane.xlu0 %4030 }
 0x7fa   : > { %v4035_v55 = vmul.f32 0.03125, %v4031_v44  ;;  %v4047_v47 = vsel %vm664_vm1, %v4041_v15, 0.0  ;;  %v4042_v19 = vmul.f32 %v4038_v46, %v4038_v46 }
 0x7fb   : > { %4048 = vadd.xlane.f32.xlu1 %v4047_v47 }
 0x7fc   : > { %v4039_v7 = vsub.f32 %v5961_v11, %v4035_v55  ;;  %v4050_v12 = vsel %vm664_vm1, %v4042_v19, 0.0 }
 0x7fd   : > { %4051 = vadd.xlane.f32.xlu0 %v4050_v12 }
 0x7fe   : > { %v4043_v9 = vmul.f32 %v4039_v7, %v4039_v7 }
 0x800   : > { %v4053_v27 = vsel %vm664_vm1, %v4043_v9, 0.0 }
 0x801   : > { %4054 = vadd.xlane.f32.xlu1 %v4053_v27 }
 0x886   : > { %v4046_v61 = vpop.xlane.xlu0 %4045 }
 0x887   : > { %v4056_v8 = vmul.f32 0.03125, %v4046_v61 }
 0x888   : > { %v4049_v48 = vpop.xlane.xlu1 %4048 }
 0x889   : > { %v4060_v29 = vadd.f32 1e-05, %v4056_v8  ;;  %v4057_v10 = vmul.f32 0.03125, %v4049_v48 }
 0x88a   : > { %v4052_v6 = vpop.xlane.xlu0 %4051 }
 0x88b   : > { %4951 = vrsqrt.f32 %v4060_v29  ;;  %v4061_v32 = vadd.f32 1e-05, %v4057_v10  ;;  %v4058_v1 = vmul.f32 0.03125, %v4052_v6 }
 0x88d   : > { %4953 = vrsqrt.f32 %v4061_v32  ;;  %v4062_v54 = vadd.f32 1e-05, %v4058_v1 }
 0x88e   : > { %v4055_v58 = vpop.xlane.xlu1 %4054 }
 0x88f   : > { %4955 = vrsqrt.f32 %v4062_v54  ;;  %v4059_v39 = vmul.f32 0.03125, %v4055_v58 }
 0x891   : > { %v4063_v35 = vadd.f32 1e-05, %v4059_v39 }
 0x893   : > { %4957 = vrsqrt.f32 %v4063_v35 }
 0x895   : > { %v4952_v53 = vpop.eup %4951 }
 0x896   : > { %v4068_v25 = vmul.f32 %v4952_v53, %v4036_v28 }
 0x897   : > { %v4954_v59 = vpop.eup %4953 }
 0x898   : > { %v4069_v62 = vmul.f32 %v4954_v59, %v4037_v63  ;;  %v4079_v3 = vmul.f32 %v4604_v18, %v4068_v25  ;;  %v4615_v59 = vld [vmem:[%s640_s21] ss:$0 sm:$0xff] }
 0x899   : > { %v4956_v4 = vpop.eup %4955 }
 0x89a   : > { %v4070_v56 = vmul.f32 %v4956_v4, %v4038_v46  ;;  %v4080_v30 = vmul.f32 %v4604_v18, %v4069_v62  ;;  %v4090_v49 = vadd.f32 %v4605_v21, %v4079_v3 }
 0x89c   : > { %v4091_v43 = vadd.f32 %v4605_v21, %v4080_v30  ;;  %v4081_v31 = vmul.f32 %v4604_v18, %v4070_v56 }
 0x89d   : > { %v4958_v22 = vpop.eup %4957 }
 0x89e   : > { %v4071_v38 = vmul.f32 %v4958_v22, %v4039_v7  ;;  %v4094_v33 = vpack.c.bf16 %v4091_v43, %v4090_v49  ;;  %v4092_v2 = vadd.f32 %v4605_v21, %v4081_v31 }
 0x8a0   : > { %v4082_v24 = vmul.f32 %v4604_v18, %v4071_v38  ;;  %4812 = vmatprep.mubr.msk.bf16.mxu0 %vm664_vm1, %v4094_v33 }
 0x8a2   : > { %v4093_v50 = vadd.f32 %v4605_v21, %v4082_v24 }
 0x8a4   : > { %v4095_v41 = vpack.c.bf16 %v4093_v50, %v4092_v2 }
 0x8a6   : > { %4813 = vmatmul.mubr.msk.bf16.vlgmr.msra.gmra.mrb[40].mxu0 %vm664_vm1, %v4095_v41 }
 0x979   : > { %v4814_v28 = vpop.f32.mrb[40].mxu0 }
 0x97a   : > { %v4168_v5 = vadd.f32 %v4814_v28, %v4606_v45  ;;  %v4159_v42 = vpop.f32.mrb[41].mxu0 }
 0x97b   : > { %v4160_v63 = vadd.f32 %v4606_v45, %v4159_v42  ;;  %v4815_v34 = vpop.f32.mrb[42].mxu0 }
 0x97c   : > { %v4613_v17 = vmul.f32 -1.702, %v4168_v5  ;;  %v4171_v46 = vadd.f32 %v4815_v34, %v4606_v45  ;;  %v4162_v51 = vpop.f32.mrb[43].mxu0 }
 0x97d   : > { %v4611_v15 = vmul.f32 -1.702, %v4160_v63  ;;  %v4163_v44 = vadd.f32 %v4606_v45, %v4162_v51 }
 0x97e   : > { %v4186_v55 = vmul.f32 1.442695, %v4613_v17  ;;  %v4614_v47 = vmul.f32 -1.702, %v4171_v46 }
 0x97f   : > { %v4182_v19 = vmul.f32 1.442695, %v4611_v15  ;;  %v4612_v7 = vmul.f32 -1.702, %v4163_v44 }
 0x980   : > { %4959 = vpow2.f32 %v4186_v55  ;;  %v4188_v12 = vmul.f32 1.442695, %v4614_v47 }
 0x981   : > { %4961 = vpow2.f32 %v4182_v19  ;;  %v4184_v9 = vmul.f32 1.442695, %v4612_v7 }
 0x982   : > { %4963 = vpow2.f32 %v4188_v12 }
 0x983   : > { %4965 = vpow2.f32 %v4184_v9 }
 0x98a   : > { %v4960_v27 = vpop.eup %4959 }
 0x98b   : > { %v4962_v57 = vpop.eup %4961  ;;  %v4192_v16 = vadd.f32 1.0, %v4960_v27 }
 0x98c   : > { %v4964_v61 = vpop.eup %4963  ;;  %v4190_v8 = vadd.f32 1.0, %v4962_v57 }
 0x98d   : > { %v4966_v48 = vpop.eup %4965  ;;  %4967 = vrcp.f32 %v4192_v16  ;;  %v4193_v29 = vadd.f32 1.0, %v4964_v61 }
 0x98e   : > { %4969 = vrcp.f32 %v4190_v8  ;;  %v4191_v10 = vadd.f32 1.0, %v4966_v48 }
 0x98f   : > { %4971 = vrcp.f32 %v4193_v29 }
 0x990   : > { %4973 = vrcp.f32 %v4191_v10 }
 0x997   : > { %v4968_v6 = vpop.eup %4967 }
 0x998   : > { %v4970_v32 = vpop.eup %4969  ;;  %v4204_v58 = vmul.f32 %v4968_v6, %v4168_v5 }
 0x999   : > { %v4972_v1 = vpop.eup %4971  ;;  %v4202_v35 = vmul.f32 %v4970_v32, %v4160_v63 }
 0x99a   : > { %v4974_v54 = vpop.eup %4973  ;;  %v4205_v39 = vmul.f32 %v4972_v1, %v4171_v46 }
 0x99b   : > { %v4203_v53 = vmul.f32 %v4974_v54, %v4163_v44 }
 0x99c   : > { %v4207_v18 = vpack.c.bf16 %v4205_v39, %v4204_v58 }
 0x99d   : > { %v4206_v25 = vpack.c.bf16 %v4203_v53, %v4202_v35 }
 0x99f   : > { %4832 = vmatprep.mubr.bf16.mxu1 %v4206_v25 }
 0x9a0   : > { %4833 = vmatmul.mubr.bf16.vlgmr.msra.gmra.mrb[32].mxu1 %v4207_v18 }
 0xa73   : > { %v4834_v62 = vpop.f32.mrb[32].mxu1 }
 0xa74   : > { %v4322_v3 = vadd.f32 %v4834_v62, %v4615_v59  ;;  %v4313_v4 = vpop.f32.mrb[33].mxu1 }
 0xa75   : > { %v4314_v21 = vadd.f32 %v4615_v59, %v4313_v4  ;;  %v4835_v56 = vpop.f32.mrb[34].mxu1  ;;  %4339 = sbr.rel (%p4624_p6) target bundleno = 2684 (0xa7c), region = 80 }
 0xa76   : > { %v4330_v30 = vadd.f32 %v4322_v3, %v5953_v52  ;;  %v4325_v49 = vadd.f32 %v4835_v56, %v4615_v59  ;;  %v4316_v43 = vpop.f32.mrb[35].mxu1 }
 0xa77   : > { %v4328_v22 = vadd.f32 %v4314_v21, %v5951_v60  ;;  %v4317_v31 = vadd.f32 %v4615_v59, %v4316_v43 }
 0xa78   : > { %4334 = vst.msk [vmem:[#allocation2 + $0x10] sm:$0xff] %vm664_vm1, %v4330_v30  ;;  %v4331_v38 = vadd.f32 %v4325_v49, %v5961_v11  ;;  %4342 = vst.msk [vmem:[#allocation3 + $0x10] sm:$0xff] (!%p4624_p6), %vm664_vm1, %v4330_v30 }
 0xa79   : > { %4332 = vst.msk [vmem:[#allocation2] sm:$0xff] %vm664_vm1, %v4328_v22  ;;  %v4329_v33 = vadd.f32 %v4317_v31, %v5955_v40  ;;  %4340 = vst.msk [vmem:[#allocation3] sm:$0xff] (!%p4624_p6), %vm664_vm1, %v4328_v22 }
 0xa7a   : > { %4335 = vst.msk [vmem:[#allocation2 + $0x18] sm:$0xff] %vm664_vm1, %v4331_v38  ;;  %4343 = vst.msk [vmem:[#allocation3 + $0x18] sm:$0xff] (!%p4624_p6), %vm664_vm1, %v4331_v38 }
 0xa7b   : > { %4333 = vst.msk [vmem:[#allocation2 + $0x8] sm:$0xff] %vm664_vm1, %v4329_v33  ;;  %4341 = vst.msk [vmem:[#allocation3 + $0x8] sm:$0xff] (!%p4624_p6), %vm664_vm1, %v4329_v33 }
 0xa7c PF: > { %s6090_s30 = sld [smem:[#allocation7_spill]]  ;;  %s5046_s15 = smov [#allocation3]  }
 0xa7d   : > { %s4354_s28 = sshll.u32 %s5046_s15, 4  ;;  %s4355_s28 = int_to_ptr.vmem [resolvable:$true] %s4354_s28 }
 0xa7e   : > { %s4979_s25 = scalar_lea.vmem %s4355_s28, 512  ;;  %p4986_p11 = scmp.lt.s32.totalorder %s4355_s28, %s4355_s28 }
 0xa7f   : > { %p4980_p8 = scmp.ne.s32.totalorder %s4355_s28, %s4979_s25  ;;  %p4987_p12 = scmp.lt.s32.totalorder %s4979_s25, %s4979_s25 }
 0xa81   : > { %p4988_p13 = por %p4987_p12, %p4986_p11 }
 0xa82   : > { %s6091_s21 = sadd.s32 4294967295, %s6090_s30  }
 0xa83   : > { %p6022_p7 = scmp.eq.s32.totalorder %s6091_s21, 1 }
 0xa85   : > { %p4981_p9 = pnand %p4980_p8, %p6022_p7 }
 0xa87   : > { %p4982_p10 = pneg %p4981_p9 }
 0xa89   : > { %p4989_p0 = pnand %p4988_p13, %p4982_p10 }
 0xa8b   : > { %4992 = shalt.err (!%p4989_p0)
}
 0xa8c   : > { %s6093_s19 = sld [smem:[#allocation12_spill]] }
 0xa92   : > { %s4993_s18 = scalar_lea.hbm %s6093_s19, 512 }
 0xa93   : > { %p4994_p1 = scmp.ne.s32.totalorder %s6093_s19, %s4993_s18  ;;  %p4999_p4 = scmp.lt.u32.totalorder %s4993_s18, %s6093_s19 }
 0xa95   : > { %p4995_p2 = pnand %p4994_p1, %p6022_p7 }
 0xa97   : > { %p4996_p3 = pneg %p4995_p2 }
 0xa99   : > { %p5001_p5 = pnand %p4999_p4, %p4996_p3 }
 0xa9b   : > { %5004 = shalt.err (!%p5001_p5)
}
 0xa9c   : > { %s5047_s14 = smov 128  }
 0xa9d   : > { %4837 = dma.vmem_to_hbm [thread:$0]  (%p6022_p7), %s4355_s28, 512, %s6093_s19, [#allocation4], %s5047_s14, %s5047_s14, %s5044_s29  }
 0xa9e   : > { %5018 = dma.done.wait (%p6022_p7), [#allocation4], 512  }
 0xa9f   : > { %5020 = vsyncadd (%p6022_p7), [#allocation4], 4294966784 }
 0xaa0 PF: > { %s6094_s5 = sld [smem:[#allocation7_spill]]  ;;  %s6095_s25 = sld [smem:[#allocation6_spill]] }
 0xaa1   : > { %s6096_s26 = sld [smem:[#allocation8_spill]] }
 0xaa6   : > { %s24_s27 = sadd.s32 1, %s6094_s5  }
 0xaa7   : > { %p21_p6 = scmp.ge.s32.totalorder %s24_s27, 4  }
 0xaa9   :  { %23 = sbr.rel (!%p21_p6) target bundleno = 6 (0x6), region = 144 }
 0xab0   :  { %4370 = vsyncpa [#allocation4], 1 }
 0xab1   :  { %4372 = vsyncpa [#allocation4 + $0x1], 1 }

</bundles_post_ra>
